<compile_context>
chip_gen: v5e
topology: v5e:2x2
jax: 0.10.0
libtpu: 0.0.40
codegen_flags: <defaults>
</compile_context>

<pallas_src>
import math
from functools import partial

import jax
import jax.numpy as jnp
from jax import lax
from jax.experimental import pallas as pl
from jax.experimental.pallas import tpu as pltpu

# ----------------------------- config (small, synthetic) --------------------
N_BATCH = 2     # number of prompts
SEQ_LEN = 8     # context length
WIDTH = 32      # transformer width D
NUM_HEADS = 4
NUM_LAYERS = 2
EMBED_DIM = 32  # text_projection output dim
EPS = 1e-5

# dot_general dimension numbers (single batch dim = N*H)
_DN_QKT = (((2,), (2,)), ((0,), (0,)))   # (B,L,hd) x (B,L,hd) -> (B,L,L)
_DN_BMM = (((2,), (1,)), ((0,), (0,)))   # (B,L,K)  x (B,K,E)  -> (B,L,E)


def _layernorm(v, w, b):
    mu = jnp.mean(v, axis=-1, keepdims=True)
    var = jnp.mean((v - mu) ** 2, axis=-1, keepdims=True)
    return (v - mu) * lax.rsqrt(var + EPS) * w + b


# ----------------------------- fused kernel ----------------------------------
def text_encoder_kernel(idx_ref, x_ref, pos_ref, *refs,
                        num_layers, num_heads, seq_len, n_batch):
    """Full TextEncoder forward, single invocation, everything resident in VMEM.

    refs = 12 weight refs per layer, then lnf_w, lnf_b, proj, then o_ref, then
    xs scratch (VMEM, (N*L, D)).
    """
    n_w = 12 * num_layers
    w_refs = refs[:n_w]
    lnf_w_ref, lnf_b_ref, proj_ref = refs[n_w:n_w + 3]
    o_ref = refs[n_w + 3]
    xs_ref = refs[n_w + 4]

    L = seq_len
    Nb = n_batch
    H = num_heads

    # positional embedding add fused in (pos pre-tiled to (N*L, D) in the wrapper)
    x = x_ref[...] + pos_ref[...]                                    # (N*L, D)
    D = x.shape[1]
    hd = D // H

    # causal mask, built exactly once (broadcasts over the N*H batch dim)
    row = lax.broadcasted_iota(jnp.int32, (L, L), 0)
    col = lax.broadcasted_iota(jnp.int32, (L, L), 1)
    mask = jnp.where(col <= row, 0.0, -1e30).astype(jnp.float32)     # (L, L)

    for li in range(num_layers):
        # weights read once per layer (no inner loop re-reads)
        (ln1_w, ln1_b, wqkv, bqkv, wo, bo,
         ln2_w, ln2_b, wfc, bfc, wpr, bpr) = (r[...] for r in
                                              w_refs[12 * li:12 * (li + 1)])

        # ---------------- attention branch ----------------
        h = _layernorm(x, ln1_w, ln1_b)                              # (N*L, D)

        # fused, lane-dense QKV projection: ONE matmul per layer.
        # 1/sqrt(hd) scale is pre-folded into the Q columns of wqkv/bqkv.
        qkv = jnp.dot(h, wqkv, preferred_element_type=jnp.float32) + bqkv  # (N*L, 3D)
        q, k, v = qkv[:, :D], qkv[:, D:2 * D], qkv[:, 2 * D:]

        # layout plumbing only: (N*L, D) -> (N*H, L, hd) via static slices + stack
        # (no per-head re-projection, no broadcast_to of activations).
        def heads(t):
            return jnp.stack([t[n * L:(n + 1) * L, hh * hd:(hh + 1) * hd]
                              for n in range(Nb) for hh in range(H)], axis=0)

        qb, kb, vb = heads(q), heads(k), heads(v)                    # (N*H, L, hd)

        # batched scores + softmax + PV over the single N*H batch dim
        s = lax.dot_general(qb, kb, _DN_QKT,
                            preferred_element_type=jnp.float32) + mask      # (N*H, L, L)
        s = s - jnp.max(s, axis=-1, keepdims=True)
        p = jnp.exp(s)
        p = p * pl.reciprocal(jnp.sum(p, axis=-1, keepdims=True), approx=True)
        ob = lax.dot_general(p, vb, _DN_BMM,
                             preferred_element_type=jnp.float32)            # (N*H, L, hd)

        # heads-concat back to (N*L, D), then ONE dense output projection (K = D).
        attn_in = jnp.concatenate(
            [jnp.concatenate([ob[n * H + hh] for hh in range(H)], axis=-1)
             for n in range(Nb)], axis=0)                            # (N*L, D)
        attn = jnp.dot(attn_in, wo, preferred_element_type=jnp.float32) + bo
        x = x + attn

        # ---------------- MLP branch (QuickGELU) ----------------
        # NOTE: exp / reciprocal / sigmoid all share the single EUP slot; at real
        # sizes check the bundle dump before assuming the matmuls hide them.
        h2 = _layernorm(x, ln2_w, ln2_b)
        z = jnp.dot(h2, wfc, preferred_element_type=jnp.float32) + bfc
        z = z * (1.0 / (1.0 + jnp.exp(-1.702 * z)))
        z = jnp.dot(z, wpr, preferred_element_type=jnp.float32) + bpr
        x = x + z

    # ---------------- ln_final + EOT gather + text_projection ----------------
    xs_ref[...] = x                                                   # park x in scratch
    rows = [xs_ref[pl.ds(idx_ref[n] + n * L, 1), :] for n in range(Nb)]
    g = jnp.concatenate(rows, axis=0)                                 # (N, D)
    g = _layernorm(g, lnf_w_ref[...], lnf_b_ref[...])                 # LN only N rows
    o_ref[...] = jnp.dot(g, proj_ref[...], preferred_element_type=jnp.float32)


# ----------------------------- wrapper ---------------------------------------
def _layer_args(lp, D, H):
    """Host-side (one-time) weight prep: fold 1/sqrt(hd) into the Q columns."""
    hd = D // H
    scale = 1.0 / math.sqrt(hd)
    col_scale = jnp.concatenate([jnp.full((D,), scale, jnp.float32),
                                 jnp.ones((2 * D,), jnp.float32)])[None, :]   # (1, 3D)
    wqkv = lp["wqkv"] * col_scale
    bqkv = lp["bqkv"] * col_scale
    return [lp["ln1_w"], lp["ln1_b"], wqkv, bqkv, lp["wo"], lp["bo"],
            lp["ln2_w"], lp["ln2_b"], lp["wfc"], lp["bfc"], lp["wpr"], lp["bpr"]]


def text_encoder_forward(prompts, tokenized_prompts, params):
    """Pallas implementation of TextEncoder.forward (single fused kernel)."""
    N, L, D = prompts.shape
    E = params["proj"].shape[1]
    H = NUM_HEADS

    # glue: EOT position (argmax over token ids), as in the PyTorch module
    eot_idx = jnp.argmax(tokenized_prompts, axis=-1).astype(jnp.int32)   # (N,)

    x_flat = prompts.reshape(N * L, D)
    pos_tiled = jnp.tile(params["pos"], (N, 1))                          # (N*L, D)

    weight_args = []
    for lp in params["layers"]:
        weight_args += _layer_args(lp, D, H)

    tensor_args = [x_flat, pos_tiled] + weight_args + [
        params["lnf_w"], params["lnf_b"], params["proj"]]

    in_specs = ([pl.BlockSpec(memory_space=pltpu.MemorySpace.SMEM)] +
                [pl.BlockSpec(memory_space=pltpu.MemorySpace.VMEM)] * len(tensor_args))

    kernel = partial(text_encoder_kernel,
                     num_layers=len(params["layers"]),
                     num_heads=H, seq_len=L, n_batch=N)

    # NOTE: output last dim (E=32) is below the 128-lane width -> masked store; at
    # real CLIP sizes keep E a multiple of 128 for lane-dense stores.
    return pl.pallas_call(
        kernel,
        out_shape=jax.ShapeDtypeStruct((N, E), jnp.float32),
        in_specs=in_specs,
        out_specs=pl.BlockSpec(memory_space=pltpu.MemorySpace.VMEM),
        scratch_shapes=[pltpu.VMEM((N * L, D), jnp.float32)],
        compiler_params=pltpu.CompilerParams(vmem_limit_bytes=32 * 1024 * 1024),
    )(eot_idx, *tensor_args)


# ----------------------------- pure-JAX reference ----------------------------
def reference_forward(prompts, tokenized_prompts, params):
    x = prompts + params["pos"][None]
    N, L, D = x.shape
    hd = D // NUM_HEADS
    row = jnp.arange(L)[:, None]
    col = jnp.arange(L)[None, :]
    mask = jnp.where(col <= row, 0.0, -1e30)

    def ln(v, w, b):
        mu = v.mean(-1, keepdims=True)
        var = ((v - mu) ** 2).mean(-1, keepdims=True)
        return (v - mu) / jnp.sqrt(var + EPS) * w + b

    for lp in params["layers"]:
        h = ln(x, lp["ln1_w"][0], lp["ln1_b"][0])
        qkv = h @ lp["wqkv"] + lp["bqkv"][0]
        q, k, v = jnp.split(qkv, 3, axis=-1)
        q = q.reshape(N, L, NUM_HEADS, hd)
        k = k.reshape(N, L, NUM_HEADS, hd)
        v = v.reshape(N, L, NUM_HEADS, hd)
        s = jnp.einsum("nqhd,nkhd->nhqk", q, k) / math.sqrt(hd) + mask
        p = jax.nn.softmax(s, axis=-1)
        a = jnp.einsum("nhqk,nkhd->nqhd", p, v).reshape(N, L, D)
        x = x + a @ lp["wo"] + lp["bo"][0]
        h2 = ln(x, lp["ln2_w"][0], lp["ln2_b"][0])
        z = h2 @ lp["wfc"] + lp["bfc"][0]
        z = z * jax.nn.sigmoid(1.702 * z)
        x = x + z @ lp["wpr"] + lp["bpr"][0]
    xf = ln(x, params["lnf_w"][0], params["lnf_b"][0])
    eot_idx = jnp.argmax(tokenized_prompts, axis=-1)
    g = xf[jnp.arange(N), eot_idx]
    return g @ params["proj"]


# ----------------------------- parameter init --------------------------------
def init_params(key):
    D, E = WIDTH, EMBED_DIM
    ks = jax.random.split(key, 4 + NUM_LAYERS)

    def nrm(k, shape, scale=0.02):
        return (scale * jax.random.normal(k, shape)).astype(jnp.float32)

    layers = []
    for li in range(NUM_LAYERS):
        lk = jax.random.split(ks[4 + li], 6)
        layers.append(dict(
            ln1_w=jnp.ones((1, D), jnp.float32),
            ln1_b=jnp.zeros((1, D), jnp.float32),
            # canonical layout (pre-transposed): y = x @ W + b
            wqkv=nrm(lk[0], (D, 3 * D)),
            bqkv=jnp.zeros((1, 3 * D), jnp.float32),
            wo=nrm(lk[1], (D, D)),
            bo=jnp.zeros((1, D), jnp.float32),
            ln2_w=jnp.ones((1, D), jnp.float32),
            ln2_b=jnp.zeros((1, D), jnp.float32),
            wfc=nrm(lk[2], (D, 4 * D)),
            bfc=nrm(lk[3], (1, 4 * D)),
            wpr=nrm(lk[4], (4 * D, D)),
            bpr=nrm(lk[5], (1, D)),
        ))
    return dict(
        pos=nrm(ks[0], (SEQ_LEN, D), 0.01),
        layers=layers,
        lnf_w=jnp.ones((1, D), jnp.float32),
        lnf_b=jnp.zeros((1, D), jnp.float32),
        proj=nrm(ks[1], (D, E)),
    )


# ----------------------------- main -------------------------------------------
if __name__ == "__main__":
    key = jax.random.PRNGKey(0)
    kp, kt, kw = jax.random.split(key, 3)

    params = init_params(kw)

    # prompts: learned prompt embeddings (N, L, D)
    prompts = (0.02 * jax.random.normal(kp, (N_BATCH, SEQ_LEN, WIDTH))).astype(jnp.float32)

    # tokenized_prompts: (N, L) ints with an EOT token (largest id) somewhere
    tokenized = jax.random.randint(kt, (N_BATCH, SEQ_LEN), 1, 1000, dtype=jnp.int32)
    eot_positions = jnp.array([5, 3], dtype=jnp.int32)
    tokenized = tokenized.at[jnp.arange(N_BATCH), eot_positions].set(49407)

    out = text_encoder_forward(prompts, tokenized, params)
    out = jax.block_until_ready(out)

    ref = reference_forward(prompts, tokenized, params)
    assert out.shape == (N_BATCH, EMBED_DIM)
    assert jnp.allclose(out, ref, atol=1e-3, rtol=1e-3), "mismatch vs JAX reference"

    print("KERNEL_OK")
</pallas_src>

<mosaic_0001>
module attributes {stable_mosaic.version = 11 : i64} {
  func.func @text_encoder_kernel(%arg0: memref<2xi32, #tpu.memory_space<smem>>, %arg1: memref<16x32xf32, #tpu.memory_space<vmem>>, %arg2: memref<16x32xf32, #tpu.memory_space<vmem>>, %arg3: memref<1x32xf32, #tpu.memory_space<vmem>>, %arg4: memref<1x32xf32, #tpu.memory_space<vmem>>, %arg5: memref<32x96xf32, #tpu.memory_space<vmem>>, %arg6: memref<1x96xf32, #tpu.memory_space<vmem>>, %arg7: memref<32x32xf32, #tpu.memory_space<vmem>>, %arg8: memref<1x32xf32, #tpu.memory_space<vmem>>, %arg9: memref<1x32xf32, #tpu.memory_space<vmem>>, %arg10: memref<1x32xf32, #tpu.memory_space<vmem>>, %arg11: memref<32x128xf32, #tpu.memory_space<vmem>>, %arg12: memref<1x128xf32, #tpu.memory_space<vmem>>, %arg13: memref<128x32xf32, #tpu.memory_space<vmem>>, %arg14: memref<1x32xf32, #tpu.memory_space<vmem>>, %arg15: memref<1x32xf32, #tpu.memory_space<vmem>>, %arg16: memref<1x32xf32, #tpu.memory_space<vmem>>, %arg17: memref<32x96xf32, #tpu.memory_space<vmem>>, %arg18: memref<1x96xf32, #tpu.memory_space<vmem>>, %arg19: memref<32x32xf32, #tpu.memory_space<vmem>>, %arg20: memref<1x32xf32, #tpu.memory_space<vmem>>, %arg21: memref<1x32xf32, #tpu.memory_space<vmem>>, %arg22: memref<1x32xf32, #tpu.memory_space<vmem>>, %arg23: memref<32x128xf32, #tpu.memory_space<vmem>>, %arg24: memref<1x128xf32, #tpu.memory_space<vmem>>, %arg25: memref<128x32xf32, #tpu.memory_space<vmem>>, %arg26: memref<1x32xf32, #tpu.memory_space<vmem>>, %arg27: memref<1x32xf32, #tpu.memory_space<vmem>>, %arg28: memref<1x32xf32, #tpu.memory_space<vmem>>, %arg29: memref<32x32xf32, #tpu.memory_space<vmem>>, %arg30: memref<2x32xf32, #tpu.memory_space<vmem>>, %arg31: memref<16x32xf32, #tpu.memory_space<vmem>>) attributes {dimension_semantics = [], scalar_prefetch = 0 : i64, scratch_operands = 1 : i64, tpu.core_type = #tpu.core_type<tc>} {
    %c0 = arith.constant 0 : index
    %c0_0 = arith.constant 0 : index
    %0 = vector.load %arg1[%c0, %c0_0] : memref<16x32xf32, #tpu.memory_space<vmem>>, vector<16x32xf32>
    %c0_1 = arith.constant 0 : index
    %c0_2 = arith.constant 0 : index
    %1 = vector.load %arg2[%c0_1, %c0_2] : memref<16x32xf32, #tpu.memory_space<vmem>>, vector<16x32xf32>
    %2 = arith.addf %0, %1 : vector<16x32xf32>
    %3 = tpu.iota {dimensions = array<i32: 0>} : vector<8x8xi32>
    %4 = tpu.iota {dimensions = array<i32: 1>} : vector<8x8xi32>
    %5 = arith.cmpi sle, %4, %3 : vector<8x8xi32>
    %cst = arith.constant 0.000000e+00 : f32
    %cst_3 = arith.constant -1.000000e+30 : f32
    %6 = vector.broadcast %cst : f32 to vector<8x8xf32>
    %7 = vector.broadcast %cst_3 : f32 to vector<8x8xf32>
    %8 = arith.select %5, %6, %7 : vector<8x8xi1>, vector<8x8xf32>
    %c0_4 = arith.constant 0 : index
    %c0_5 = arith.constant 0 : index
    %9 = vector.load %arg3[%c0_4, %c0_5] : memref<1x32xf32, #tpu.memory_space<vmem>>, vector<1x32xf32>
    %c0_6 = arith.constant 0 : index
    %c0_7 = arith.constant 0 : index
    %10 = vector.load %arg4[%c0_6, %c0_7] : memref<1x32xf32, #tpu.memory_space<vmem>>, vector<1x32xf32>
    %c0_8 = arith.constant 0 : index
    %c0_9 = arith.constant 0 : index
    %11 = vector.load %arg5[%c0_8, %c0_9] : memref<32x96xf32, #tpu.memory_space<vmem>>, vector<32x96xf32>
    %c0_10 = arith.constant 0 : index
    %c0_11 = arith.constant 0 : index
    %12 = vector.load %arg6[%c0_10, %c0_11] : memref<1x96xf32, #tpu.memory_space<vmem>>, vector<1x96xf32>
    %c0_12 = arith.constant 0 : index
    %c0_13 = arith.constant 0 : index
    %13 = vector.load %arg7[%c0_12, %c0_13] : memref<32x32xf32, #tpu.memory_space<vmem>>, vector<32x32xf32>
    %c0_14 = arith.constant 0 : index
    %c0_15 = arith.constant 0 : index
    %14 = vector.load %arg8[%c0_14, %c0_15] : memref<1x32xf32, #tpu.memory_space<vmem>>, vector<1x32xf32>
    %c0_16 = arith.constant 0 : index
    %c0_17 = arith.constant 0 : index
    %15 = vector.load %arg9[%c0_16, %c0_17] : memref<1x32xf32, #tpu.memory_space<vmem>>, vector<1x32xf32>
    %c0_18 = arith.constant 0 : index
    %c0_19 = arith.constant 0 : index
    %16 = vector.load %arg10[%c0_18, %c0_19] : memref<1x32xf32, #tpu.memory_space<vmem>>, vector<1x32xf32>
    %c0_20 = arith.constant 0 : index
    %c0_21 = arith.constant 0 : index
    %17 = vector.load %arg11[%c0_20, %c0_21] : memref<32x128xf32, #tpu.memory_space<vmem>>, vector<32x128xf32>
    %c0_22 = arith.constant 0 : index
    %c0_23 = arith.constant 0 : index
    %18 = vector.load %arg12[%c0_22, %c0_23] : memref<1x128xf32, #tpu.memory_space<vmem>>, vector<1x128xf32>
    %c0_24 = arith.constant 0 : index
    %c0_25 = arith.constant 0 : index
    %19 = vector.load %arg13[%c0_24, %c0_25] : memref<128x32xf32, #tpu.memory_space<vmem>>, vector<128x32xf32>
    %c0_26 = arith.constant 0 : index
    %c0_27 = arith.constant 0 : index
    %20 = vector.load %arg14[%c0_26, %c0_27] : memref<1x32xf32, #tpu.memory_space<vmem>>, vector<1x32xf32>
    %cst_28 = arith.constant dense<0.000000e+00> : vector<16xf32>
    %21 = vector.multi_reduction <add>, %2, %cst_28 [1] : vector<16x32xf32> to vector<16xf32>
    %22 = vector.shape_cast %21 : vector<16xf32> to vector<16x1xf32>
    %cst_29 = arith.constant 3.200000e+01 : f32
    %23 = vector.broadcast %cst_29 : f32 to vector<16x1xf32>
    %24 = arith.divf %22, %23 : vector<16x1xf32>
    %25 = vector.broadcast %24 : vector<16x1xf32> to vector<16x32xf32>
    %26 = arith.subf %2, %25 : vector<16x32xf32>
    %27 = arith.mulf %26, %26 : vector<16x32xf32>
    %cst_30 = arith.constant dense<0.000000e+00> : vector<16xf32>
    %28 = vector.multi_reduction <add>, %27, %cst_30 [1] : vector<16x32xf32> to vector<16xf32>
    %29 = vector.shape_cast %28 : vector<16xf32> to vector<16x1xf32>
    %cst_31 = arith.constant 3.200000e+01 : f32
    %30 = vector.broadcast %cst_31 : f32 to vector<16x1xf32>
    %31 = arith.divf %29, %30 : vector<16x1xf32>
    %32 = vector.broadcast %24 : vector<16x1xf32> to vector<16x32xf32>
    %33 = arith.subf %2, %32 : vector<16x32xf32>
    %cst_32 = arith.constant 9.99999974E-6 : f32
    %34 = vector.broadcast %cst_32 : f32 to vector<16x1xf32>
    %35 = arith.addf %31, %34 : vector<16x1xf32>
    %36 = math.rsqrt %35 : vector<16x1xf32>
    %37 = vector.broadcast %36 : vector<16x1xf32> to vector<16x32xf32>
    %38 = arith.mulf %33, %37 : vector<16x32xf32>
    %39 = vector.broadcast %9 : vector<1x32xf32> to vector<16x32xf32>
    %40 = arith.mulf %38, %39 : vector<16x32xf32>
    %41 = vector.broadcast %10 : vector<1x32xf32> to vector<16x32xf32>
    %42 = arith.addf %40, %41 : vector<16x32xf32>
    %cst_33 = arith.constant dense<0.000000e+00> : vector<16x96xf32>
    %43 = tpu.matmul %42, %11, %cst_33 {dimension_numbers = #tpu.dot_dimension_numbers<[1], [0], [0], [1], [0, 0, 1, 1], [], []>} : vector<16x32xf32>, vector<32x96xf32>, vector<16x96xf32> -> vector<16x96xf32>
    %44 = vector.broadcast %12 : vector<1x96xf32> to vector<16x96xf32>
    %45 = arith.addf %43, %44 : vector<16x96xf32>
    %46 = vector.extract_strided_slice %45 {offsets = [0, 0], sizes = [16, 32], strides = [1, 1]} : vector<16x96xf32> to vector<16x32xf32>
    %47 = vector.extract_strided_slice %45 {offsets = [0, 32], sizes = [16, 32], strides = [1, 1]} : vector<16x96xf32> to vector<16x32xf32>
    %48 = vector.extract_strided_slice %45 {offsets = [0, 64], sizes = [16, 32], strides = [1, 1]} : vector<16x96xf32> to vector<16x32xf32>
    %49 = vector.extract_strided_slice %46 {offsets = [0, 0], sizes = [8, 8], strides = [1, 1]} : vector<16x32xf32> to vector<8x8xf32>
    %50 = vector.extract_strided_slice %46 {offsets = [0, 8], sizes = [8, 8], strides = [1, 1]} : vector<16x32xf32> to vector<8x8xf32>
    %51 = vector.extract_strided_slice %46 {offsets = [0, 16], sizes = [8, 8], strides = [1, 1]} : vector<16x32xf32> to vector<8x8xf32>
    %52 = vector.extract_strided_slice %46 {offsets = [0, 24], sizes = [8, 8], strides = [1, 1]} : vector<16x32xf32> to vector<8x8xf32>
    %53 = vector.extract_strided_slice %46 {offsets = [8, 0], sizes = [8, 8], strides = [1, 1]} : vector<16x32xf32> to vector<8x8xf32>
    %54 = vector.extract_strided_slice %46 {offsets = [8, 8], sizes = [8, 8], strides = [1, 1]} : vector<16x32xf32> to vector<8x8xf32>
    %55 = vector.extract_strided_slice %46 {offsets = [8, 16], sizes = [8, 8], strides = [1, 1]} : vector<16x32xf32> to vector<8x8xf32>
    %56 = vector.extract_strided_slice %46 {offsets = [8, 24], sizes = [8, 8], strides = [1, 1]} : vector<16x32xf32> to vector<8x8xf32>
    %57 = vector.shape_cast %49 : vector<8x8xf32> to vector<1x8x8xf32>
    %58 = vector.shape_cast %50 : vector<8x8xf32> to vector<1x8x8xf32>
    %59 = vector.shape_cast %51 : vector<8x8xf32> to vector<1x8x8xf32>
    %60 = vector.shape_cast %52 : vector<8x8xf32> to vector<1x8x8xf32>
    %61 = vector.shape_cast %53 : vector<8x8xf32> to vector<1x8x8xf32>
    %62 = vector.shape_cast %54 : vector<8x8xf32> to vector<1x8x8xf32>
    %63 = vector.shape_cast %55 : vector<8x8xf32> to vector<1x8x8xf32>
    %64 = vector.shape_cast %56 : vector<8x8xf32> to vector<1x8x8xf32>
    %65 = tpu.concatenate %57, %58, %59, %60, %61, %62, %63, %64 in 0 : vector<1x8x8xf32>, vector<1x8x8xf32>, vector<1x8x8xf32>, vector<1x8x8xf32>, vector<1x8x8xf32>, vector<1x8x8xf32>, vector<1x8x8xf32>, vector<1x8x8xf32> -> vector<8x8x8xf32>
    %66 = vector.extract_strided_slice %47 {offsets = [0, 0], sizes = [8, 8], strides = [1, 1]} : vector<16x32xf32> to vector<8x8xf32>
    %67 = vector.extract_strided_slice %47 {offsets = [0, 8], sizes = [8, 8], strides = [1, 1]} : vector<16x32xf32> to vector<8x8xf32>
    %68 = vector.extract_strided_slice %47 {offsets = [0, 16], sizes = [8, 8], strides = [1, 1]} : vector<16x32xf32> to vector<8x8xf32>
    %69 = vector.extract_strided_slice %47 {offsets = [0, 24], sizes = [8, 8], strides = [1, 1]} : vector<16x32xf32> to vector<8x8xf32>
    %70 = vector.extract_strided_slice %47 {offsets = [8, 0], sizes = [8, 8], strides = [1, 1]} : vector<16x32xf32> to vector<8x8xf32>
    %71 = vector.extract_strided_slice %47 {offsets = [8, 8], sizes = [8, 8], strides = [1, 1]} : vector<16x32xf32> to vector<8x8xf32>
    %72 = vector.extract_strided_slice %47 {offsets = [8, 16], sizes = [8, 8], strides = [1, 1]} : vector<16x32xf32> to vector<8x8xf32>
    %73 = vector.extract_strided_slice %47 {offsets = [8, 24], sizes = [8, 8], strides = [1, 1]} : vector<16x32xf32> to vector<8x8xf32>
    %74 = vector.shape_cast %66 : vector<8x8xf32> to vector<1x8x8xf32>
    %75 = vector.shape_cast %67 : vector<8x8xf32> to vector<1x8x8xf32>
    %76 = vector.shape_cast %68 : vector<8x8xf32> to vector<1x8x8xf32>
    %77 = vector.shape_cast %69 : vector<8x8xf32> to vector<1x8x8xf32>
    %78 = vector.shape_cast %70 : vector<8x8xf32> to vector<1x8x8xf32>
    %79 = vector.shape_cast %71 : vector<8x8xf32> to vector<1x8x8xf32>
    %80 = vector.shape_cast %72 : vector<8x8xf32> to vector<1x8x8xf32>
    %81 = vector.shape_cast %73 : vector<8x8xf32> to vector<1x8x8xf32>
    %82 = tpu.concatenate %74, %75, %76, %77, %78, %79, %80, %81 in 0 : vector<1x8x8xf32>, vector<1x8x8xf32>, vector<1x8x8xf32>, vector<1x8x8xf32>, vector<1x8x8xf32>, vector<1x8x8xf32>, vector<1x8x8xf32>, vector<1x8x8xf32> -> vector<8x8x8xf32>
    %83 = vector.extract_strided_slice %48 {offsets = [0, 0], sizes = [8, 8], strides = [1, 1]} : vector<16x32xf32> to vector<8x8xf32>
    %84 = vector.extract_strided_slice %48 {offsets = [0, 8], sizes = [8, 8], strides = [1, 1]} : vector<16x32xf32> to vector<8x8xf32>
    %85 = vector.extract_strided_slice %48 {offsets = [0, 16], sizes = [8, 8], strides = [1, 1]} : vector<16x32xf32> to vector<8x8xf32>
    %86 = vector.extract_strided_slice %48 {offsets = [0, 24], sizes = [8, 8], strides = [1, 1]} : vector<16x32xf32> to vector<8x8xf32>
    %87 = vector.extract_strided_slice %48 {offsets = [8, 0], sizes = [8, 8], strides = [1, 1]} : vector<16x32xf32> to vector<8x8xf32>
    %88 = vector.extract_strided_slice %48 {offsets = [8, 8], sizes = [8, 8], strides = [1, 1]} : vector<16x32xf32> to vector<8x8xf32>
    %89 = vector.extract_strided_slice %48 {offsets = [8, 16], sizes = [8, 8], strides = [1, 1]} : vector<16x32xf32> to vector<8x8xf32>
    %90 = vector.extract_strided_slice %48 {offsets = [8, 24], sizes = [8, 8], strides = [1, 1]} : vector<16x32xf32> to vector<8x8xf32>
    %91 = vector.shape_cast %83 : vector<8x8xf32> to vector<1x8x8xf32>
    %92 = vector.shape_cast %84 : vector<8x8xf32> to vector<1x8x8xf32>
    %93 = vector.shape_cast %85 : vector<8x8xf32> to vector<1x8x8xf32>
    %94 = vector.shape_cast %86 : vector<8x8xf32> to vector<1x8x8xf32>
    %95 = vector.shape_cast %87 : vector<8x8xf32> to vector<1x8x8xf32>
    %96 = vector.shape_cast %88 : vector<8x8xf32> to vector<1x8x8xf32>
    %97 = vector.shape_cast %89 : vector<8x8xf32> to vector<1x8x8xf32>
    %98 = vector.shape_cast %90 : vector<8x8xf32> to vector<1x8x8xf32>
    %99 = tpu.concatenate %91, %92, %93, %94, %95, %96, %97, %98 in 0 : vector<1x8x8xf32>, vector<1x8x8xf32>, vector<1x8x8xf32>, vector<1x8x8xf32>, vector<1x8x8xf32>, vector<1x8x8xf32>, vector<1x8x8xf32>, vector<1x8x8xf32> -> vector<8x8x8xf32>
    %cst_34 = arith.constant dense<0.000000e+00> : vector<8x8x8xf32>
    %100 = tpu.matmul %65, %82, %cst_34 {dimension_numbers = #tpu.dot_dimension_numbers<[2], [2], [1], [1], [0, 0, 0, 1, 1, 1], [0], [0]>} : vector<8x8x8xf32>, vector<8x8x8xf32>, vector<8x8x8xf32> -> vector<8x8x8xf32>
    %101 = vector.shape_cast %8 : vector<8x8xf32> to vector<1x8x8xf32>
    %102 = vector.broadcast %101 : vector<1x8x8xf32> to vector<8x8x8xf32>
    %103 = arith.addf %100, %102 : vector<8x8x8xf32>
    %cst_35 = arith.constant dense<0xFF800000> : vector<8x8xf32>
    %104 = vector.multi_reduction <maximumf>, %103, %cst_35 [2] : vector<8x8x8xf32> to vector<8x8xf32>
    %105 = vector.shape_cast %104 : vector<8x8xf32> to vector<8x8x1xf32>
    %106 = vector.broadcast %105 : vector<8x8x1xf32> to vector<8x8x8xf32>
    %107 = arith.subf %103, %106 : vector<8x8x8xf32>
    %108 = math.exp %107 : vector<8x8x8xf32>
    %cst_36 = arith.constant dense<0.000000e+00> : vector<8x8xf32>
    %109 = vector.multi_reduction <add>, %108, %cst_36 [2] : vector<8x8x8xf32> to vector<8x8xf32>
    %110 = vector.shape_cast %109 : vector<8x8xf32> to vector<8x8x1xf32>
    %111 = tpu.reciprocal %110 {approx = true} : vector<8x8x1xf32> -> vector<8x8x1xf32>
    %112 = vector.broadcast %111 : vector<8x8x1xf32> to vector<8x8x8xf32>
    %113 = arith.mulf %108, %112 : vector<8x8x8xf32>
    %cst_37 = arith.constant dense<0.000000e+00> : vector<8x8x8xf32>
    %114 = tpu.matmul %113, %99, %cst_37 {dimension_numbers = #tpu.dot_dimension_numbers<[2], [1], [1], [2], [0, 0, 0, 1, 1, 2], [0], [0]>} : vector<8x8x8xf32>, vector<8x8x8xf32>, vector<8x8x8xf32> -> vector<8x8x8xf32>
    %115 = vector.extract_strided_slice %114 {offsets = [0, 0, 0], sizes = [1, 8, 8], strides = [1, 1, 1]} : vector<8x8x8xf32> to vector<1x8x8xf32>
    %116 = vector.shape_cast %115 : vector<1x8x8xf32> to vector<8x8xf32>
    %117 = vector.extract_strided_slice %114 {offsets = [1, 0, 0], sizes = [1, 8, 8], strides = [1, 1, 1]} : vector<8x8x8xf32> to vector<1x8x8xf32>
    %118 = vector.shape_cast %117 : vector<1x8x8xf32> to vector<8x8xf32>
    %119 = vector.extract_strided_slice %114 {offsets = [2, 0, 0], sizes = [1, 8, 8], strides = [1, 1, 1]} : vector<8x8x8xf32> to vector<1x8x8xf32>
    %120 = vector.shape_cast %119 : vector<1x8x8xf32> to vector<8x8xf32>
    %121 = vector.extract_strided_slice %114 {offsets = [3, 0, 0], sizes = [1, 8, 8], strides = [1, 1, 1]} : vector<8x8x8xf32> to vector<1x8x8xf32>
    %122 = vector.shape_cast %121 : vector<1x8x8xf32> to vector<8x8xf32>
    %123 = tpu.concatenate %116, %118, %120, %122 in 1 : vector<8x8xf32>, vector<8x8xf32>, vector<8x8xf32>, vector<8x8xf32> -> vector<8x32xf32>
    %124 = vector.extract_strided_slice %114 {offsets = [4, 0, 0], sizes = [1, 8, 8], strides = [1, 1, 1]} : vector<8x8x8xf32> to vector<1x8x8xf32>
    %125 = vector.shape_cast %124 : vector<1x8x8xf32> to vector<8x8xf32>
    %126 = vector.extract_strided_slice %114 {offsets = [5, 0, 0], sizes = [1, 8, 8], strides = [1, 1, 1]} : vector<8x8x8xf32> to vector<1x8x8xf32>
    %127 = vector.shape_cast %126 : vector<1x8x8xf32> to vector<8x8xf32>
    %128 = vector.extract_strided_slice %114 {offsets = [6, 0, 0], sizes = [1, 8, 8], strides = [1, 1, 1]} : vector<8x8x8xf32> to vector<1x8x8xf32>
    %129 = vector.shape_cast %128 : vector<1x8x8xf32> to vector<8x8xf32>
    %130 = vector.extract_strided_slice %114 {offsets = [7, 0, 0], sizes = [1, 8, 8], strides = [1, 1, 1]} : vector<8x8x8xf32> to vector<1x8x8xf32>
    %131 = vector.shape_cast %130 : vector<1x8x8xf32> to vector<8x8xf32>
    %132 = tpu.concatenate %125, %127, %129, %131 in 1 : vector<8x8xf32>, vector<8x8xf32>, vector<8x8xf32>, vector<8x8xf32> -> vector<8x32xf32>
    %133 = tpu.concatenate %123, %132 in 0 : vector<8x32xf32>, vector<8x32xf32> -> vector<16x32xf32>
    %cst_38 = arith.constant dense<0.000000e+00> : vector<16x32xf32>
    %134 = tpu.matmul %133, %13, %cst_38 {dimension_numbers = #tpu.dot_dimension_numbers<[1], [0], [0], [1], [0, 0, 1, 1], [], []>} : vector<16x32xf32>, vector<32x32xf32>, vector<16x32xf32> -> vector<16x32xf32>
    %135 = vector.broadcast %14 : vector<1x32xf32> to vector<16x32xf32>
    %136 = arith.addf %134, %135 : vector<16x32xf32>
    %137 = arith.addf %2, %136 : vector<16x32xf32>
    %cst_39 = arith.constant dense<0.000000e+00> : vector<16xf32>
    %138 = vector.multi_reduction <add>, %137, %cst_39 [1] : vector<16x32xf32> to vector<16xf32>
    %139 = vector.shape_cast %138 : vector<16xf32> to vector<16x1xf32>
    %cst_40 = arith.constant 3.200000e+01 : f32
    %140 = vector.broadcast %cst_40 : f32 to vector<16x1xf32>
    %141 = arith.divf %139, %140 : vector<16x1xf32>
    %142 = vector.broadcast %141 : vector<16x1xf32> to vector<16x32xf32>
    %143 = arith.subf %137, %142 : vector<16x32xf32>
    %144 = arith.mulf %143, %143 : vector<16x32xf32>
    %cst_41 = arith.constant dense<0.000000e+00> : vector<16xf32>
    %145 = vector.multi_reduction <add>, %144, %cst_41 [1] : vector<16x32xf32> to vector<16xf32>
    %146 = vector.shape_cast %145 : vector<16xf32> to vector<16x1xf32>
    %cst_42 = arith.constant 3.200000e+01 : f32
    %147 = vector.broadcast %cst_42 : f32 to vector<16x1xf32>
    %148 = arith.divf %146, %147 : vector<16x1xf32>
    %149 = vector.broadcast %141 : vector<16x1xf32> to vector<16x32xf32>
    %150 = arith.subf %137, %149 : vector<16x32xf32>
    %cst_43 = arith.constant 9.99999974E-6 : f32
    %151 = vector.broadcast %cst_43 : f32 to vector<16x1xf32>
    %152 = arith.addf %148, %151 : vector<16x1xf32>
    %153 = math.rsqrt %152 : vector<16x1xf32>
    %154 = vector.broadcast %153 : vector<16x1xf32> to vector<16x32xf32>
    %155 = arith.mulf %150, %154 : vector<16x32xf32>
    %156 = vector.broadcast %15 : vector<1x32xf32> to vector<16x32xf32>
    %157 = arith.mulf %155, %156 : vector<16x32xf32>
    %158 = vector.broadcast %16 : vector<1x32xf32> to vector<16x32xf32>
    %159 = arith.addf %157, %158 : vector<16x32xf32>
    %cst_44 = arith.constant dense<0.000000e+00> : vector<16x128xf32>
    %160 = tpu.matmul %159, %17, %cst_44 {dimension_numbers = #tpu.dot_dimension_numbers<[1], [0], [0], [1], [0, 0, 1, 1], [], []>} : vector<16x32xf32>, vector<32x128xf32>, vector<16x128xf32> -> vector<16x128xf32>
    %161 = vector.broadcast %18 : vector<1x128xf32> to vector<16x128xf32>
    %162 = arith.addf %160, %161 : vector<16x128xf32>
    %cst_45 = arith.constant -1.702000e+00 : f32
    %163 = vector.broadcast %cst_45 : f32 to vector<16x128xf32>
    %164 = arith.mulf %163, %162 : vector<16x128xf32>
    %165 = math.exp %164 : vector<16x128xf32>
    %cst_46 = arith.constant 1.000000e+00 : f32
    %166 = vector.broadcast %cst_46 : f32 to vector<16x128xf32>
    %167 = arith.addf %166, %165 : vector<16x128xf32>
    %cst_47 = arith.constant 1.000000e+00 : f32
    %168 = vector.broadcast %cst_47 : f32 to vector<16x128xf32>
    %169 = arith.divf %168, %167 : vector<16x128xf32>
    %170 = arith.mulf %162, %169 : vector<16x128xf32>
    %cst_48 = arith.constant dense<0.000000e+00> : vector<16x32xf32>
    %171 = tpu.matmul %170, %19, %cst_48 {dimension_numbers = #tpu.dot_dimension_numbers<[1], [0], [0], [1], [0, 0, 1, 1], [], []>} : vector<16x128xf32>, vector<128x32xf32>, vector<16x32xf32> -> vector<16x32xf32>
    %172 = vector.broadcast %20 : vector<1x32xf32> to vector<16x32xf32>
    %173 = arith.addf %171, %172 : vector<16x32xf32>
    %174 = arith.addf %137, %173 : vector<16x32xf32>
    %c0_49 = arith.constant 0 : index
    %c0_50 = arith.constant 0 : index
    %175 = vector.load %arg15[%c0_49, %c0_50] : memref<1x32xf32, #tpu.memory_space<vmem>>, vector<1x32xf32>
    %c0_51 = arith.constant 0 : index
    %c0_52 = arith.constant 0 : index
    %176 = vector.load %arg16[%c0_51, %c0_52] : memref<1x32xf32, #tpu.memory_space<vmem>>, vector<1x32xf32>
    %c0_53 = arith.constant 0 : index
    %c0_54 = arith.constant 0 : index
    %177 = vector.load %arg17[%c0_53, %c0_54] : memref<32x96xf32, #tpu.memory_space<vmem>>, vector<32x96xf32>
    %c0_55 = arith.constant 0 : index
    %c0_56 = arith.constant 0 : index
    %178 = vector.load %arg18[%c0_55, %c0_56] : memref<1x96xf32, #tpu.memory_space<vmem>>, vector<1x96xf32>
    %c0_57 = arith.constant 0 : index
    %c0_58 = arith.constant 0 : index
    %179 = vector.load %arg19[%c0_57, %c0_58] : memref<32x32xf32, #tpu.memory_space<vmem>>, vector<32x32xf32>
    %c0_59 = arith.constant 0 : index
    %c0_60 = arith.constant 0 : index
    %180 = vector.load %arg20[%c0_59, %c0_60] : memref<1x32xf32, #tpu.memory_space<vmem>>, vector<1x32xf32>
    %c0_61 = arith.constant 0 : index
    %c0_62 = arith.constant 0 : index
    %181 = vector.load %arg21[%c0_61, %c0_62] : memref<1x32xf32, #tpu.memory_space<vmem>>, vector<1x32xf32>
    %c0_63 = arith.constant 0 : index
    %c0_64 = arith.constant 0 : index
    %182 = vector.load %arg22[%c0_63, %c0_64] : memref<1x32xf32, #tpu.memory_space<vmem>>, vector<1x32xf32>
    %c0_65 = arith.constant 0 : index
    %c0_66 = arith.constant 0 : index
    %183 = vector.load %arg23[%c0_65, %c0_66] : memref<32x128xf32, #tpu.memory_space<vmem>>, vector<32x128xf32>
    %c0_67 = arith.constant 0 : index
    %c0_68 = arith.constant 0 : index
    %184 = vector.load %arg24[%c0_67, %c0_68] : memref<1x128xf32, #tpu.memory_space<vmem>>, vector<1x128xf32>
    %c0_69 = arith.constant 0 : index
    %c0_70 = arith.constant 0 : index
    %185 = vector.load %arg25[%c0_69, %c0_70] : memref<128x32xf32, #tpu.memory_space<vmem>>, vector<128x32xf32>
    %c0_71 = arith.constant 0 : index
    %c0_72 = arith.constant 0 : index
    %186 = vector.load %arg26[%c0_71, %c0_72] : memref<1x32xf32, #tpu.memory_space<vmem>>, vector<1x32xf32>
    %cst_73 = arith.constant dense<0.000000e+00> : vector<16xf32>
    %187 = vector.multi_reduction <add>, %174, %cst_73 [1] : vector<16x32xf32> to vector<16xf32>
    %188 = vector.shape_cast %187 : vector<16xf32> to vector<16x1xf32>
    %cst_74 = arith.constant 3.200000e+01 : f32
    %189 = vector.broadcast %cst_74 : f32 to vector<16x1xf32>
    %190 = arith.divf %188, %189 : vector<16x1xf32>
    %191 = vector.broadcast %190 : vector<16x1xf32> to vector<16x32xf32>
    %192 = arith.subf %174, %191 : vector<16x32xf32>
    %193 = arith.mulf %192, %192 : vector<16x32xf32>
    %cst_75 = arith.constant dense<0.000000e+00> : vector<16xf32>
    %194 = vector.multi_reduction <add>, %193, %cst_75 [1] : vector<16x32xf32> to vector<16xf32>
    %195 = vector.shape_cast %194 : vector<16xf32> to vector<16x1xf32>
    %cst_76 = arith.constant 3.200000e+01 : f32
    %196 = vector.broadcast %cst_76 : f32 to vector<16x1xf32>
    %197 = arith.divf %195, %196 : vector<16x1xf32>
    %198 = vector.broadcast %190 : vector<16x1xf32> to vector<16x32xf32>
    %199 = arith.subf %174, %198 : vector<16x32xf32>
    %cst_77 = arith.constant 9.99999974E-6 : f32
    %200 = vector.broadcast %cst_77 : f32 to vector<16x1xf32>
    %201 = arith.addf %197, %200 : vector<16x1xf32>
    %202 = math.rsqrt %201 : vector<16x1xf32>
    %203 = vector.broadcast %202 : vector<16x1xf32> to vector<16x32xf32>
    %204 = arith.mulf %199, %203 : vector<16x32xf32>
    %205 = vector.broadcast %175 : vector<1x32xf32> to vector<16x32xf32>
    %206 = arith.mulf %204, %205 : vector<16x32xf32>
    %207 = vector.broadcast %176 : vector<1x32xf32> to vector<16x32xf32>
    %208 = arith.addf %206, %207 : vector<16x32xf32>
    %cst_78 = arith.constant dense<0.000000e+00> : vector<16x96xf32>
    %209 = tpu.matmul %208, %177, %cst_78 {dimension_numbers = #tpu.dot_dimension_numbers<[1], [0], [0], [1], [0, 0, 1, 1], [], []>} : vector<16x32xf32>, vector<32x96xf32>, vector<16x96xf32> -> vector<16x96xf32>
    %210 = vector.broadcast %178 : vector<1x96xf32> to vector<16x96xf32>
    %211 = arith.addf %209, %210 : vector<16x96xf32>
    %212 = vector.extract_strided_slice %211 {offsets = [0, 0], sizes = [16, 32], strides = [1, 1]} : vector<16x96xf32> to vector<16x32xf32>
    %213 = vector.extract_strided_slice %211 {offsets = [0, 32], sizes = [16, 32], strides = [1, 1]} : vector<16x96xf32> to vector<16x32xf32>
    %214 = vector.extract_strided_slice %211 {offsets = [0, 64], sizes = [16, 32], strides = [1, 1]} : vector<16x96xf32> to vector<16x32xf32>
    %215 = vector.extract_strided_slice %212 {offsets = [0, 0], sizes = [8, 8], strides = [1, 1]} : vector<16x32xf32> to vector<8x8xf32>
    %216 = vector.extract_strided_slice %212 {offsets = [0, 8], sizes = [8, 8], strides = [1, 1]} : vector<16x32xf32> to vector<8x8xf32>
    %217 = vector.extract_strided_slice %212 {offsets = [0, 16], sizes = [8, 8], strides = [1, 1]} : vector<16x32xf32> to vector<8x8xf32>
    %218 = vector.extract_strided_slice %212 {offsets = [0, 24], sizes = [8, 8], strides = [1, 1]} : vector<16x32xf32> to vector<8x8xf32>
    %219 = vector.extract_strided_slice %212 {offsets = [8, 0], sizes = [8, 8], strides = [1, 1]} : vector<16x32xf32> to vector<8x8xf32>
    %220 = vector.extract_strided_slice %212 {offsets = [8, 8], sizes = [8, 8], strides = [1, 1]} : vector<16x32xf32> to vector<8x8xf32>
    %221 = vector.extract_strided_slice %212 {offsets = [8, 16], sizes = [8, 8], strides = [1, 1]} : vector<16x32xf32> to vector<8x8xf32>
    %222 = vector.extract_strided_slice %212 {offsets = [8, 24], sizes = [8, 8], strides = [1, 1]} : vector<16x32xf32> to vector<8x8xf32>
    %223 = vector.shape_cast %215 : vector<8x8xf32> to vector<1x8x8xf32>
    %224 = vector.shape_cast %216 : vector<8x8xf32> to vector<1x8x8xf32>
    %225 = vector.shape_cast %217 : vector<8x8xf32> to vector<1x8x8xf32>
    %226 = vector.shape_cast %218 : vector<8x8xf32> to vector<1x8x8xf32>
    %227 = vector.shape_cast %219 : vector<8x8xf32> to vector<1x8x8xf32>
    %228 = vector.shape_cast %220 : vector<8x8xf32> to vector<1x8x8xf32>
    %229 = vector.shape_cast %221 : vector<8x8xf32> to vector<1x8x8xf32>
    %230 = vector.shape_cast %222 : vector<8x8xf32> to vector<1x8x8xf32>
    %231 = tpu.concatenate %223, %224, %225, %226, %227, %228, %229, %230 in 0 : vector<1x8x8xf32>, vector<1x8x8xf32>, vector<1x8x8xf32>, vector<1x8x8xf32>, vector<1x8x8xf32>, vector<1x8x8xf32>, vector<1x8x8xf32>, vector<1x8x8xf32> -> vector<8x8x8xf32>
    %232 = vector.extract_strided_slice %213 {offsets = [0, 0], sizes = [8, 8], strides = [1, 1]} : vector<16x32xf32> to vector<8x8xf32>
    %233 = vector.extract_strided_slice %213 {offsets = [0, 8], sizes = [8, 8], strides = [1, 1]} : vector<16x32xf32> to vector<8x8xf32>
    %234 = vector.extract_strided_slice %213 {offsets = [0, 16], sizes = [8, 8], strides = [1, 1]} : vector<16x32xf32> to vector<8x8xf32>
    %235 = vector.extract_strided_slice %213 {offsets = [0, 24], sizes = [8, 8], strides = [1, 1]} : vector<16x32xf32> to vector<8x8xf32>
    %236 = vector.extract_strided_slice %213 {offsets = [8, 0], sizes = [8, 8], strides = [1, 1]} : vector<16x32xf32> to vector<8x8xf32>
    %237 = vector.extract_strided_slice %213 {offsets = [8, 8], sizes = [8, 8], strides = [1, 1]} : vector<16x32xf32> to vector<8x8xf32>
    %238 = vector.extract_strided_slice %213 {offsets = [8, 16], sizes = [8, 8], strides = [1, 1]} : vector<16x32xf32> to vector<8x8xf32>
    %239 = vector.extract_strided_slice %213 {offsets = [8, 24], sizes = [8, 8], strides = [1, 1]} : vector<16x32xf32> to vector<8x8xf32>
    %240 = vector.shape_cast %232 : vector<8x8xf32> to vector<1x8x8xf32>
    %241 = vector.shape_cast %233 : vector<8x8xf32> to vector<1x8x8xf32>
    %242 = vector.shape_cast %234 : vector<8x8xf32> to vector<1x8x8xf32>
    %243 = vector.shape_cast %235 : vector<8x8xf32> to vector<1x8x8xf32>
    %244 = vector.shape_cast %236 : vector<8x8xf32> to vector<1x8x8xf32>
    %245 = vector.shape_cast %237 : vector<8x8xf32> to vector<1x8x8xf32>
    %246 = vector.shape_cast %238 : vector<8x8xf32> to vector<1x8x8xf32>
    %247 = vector.shape_cast %239 : vector<8x8xf32> to vector<1x8x8xf32>
    %248 = tpu.concatenate %240, %241, %242, %243, %244, %245, %246, %247 in 0 : vector<1x8x8xf32>, vector<1x8x8xf32>, vector<1x8x8xf32>, vector<1x8x8xf32>, vector<1x8x8xf32>, vector<1x8x8xf32>, vector<1x8x8xf32>, vector<1x8x8xf32> -> vector<8x8x8xf32>
    %249 = vector.extract_strided_slice %214 {offsets = [0, 0], sizes = [8, 8], strides = [1, 1]} : vector<16x32xf32> to vector<8x8xf32>
    %250 = vector.extract_strided_slice %214 {offsets = [0, 8], sizes = [8, 8], strides = [1, 1]} : vector<16x32xf32> to vector<8x8xf32>
    %251 = vector.extract_strided_slice %214 {offsets = [0, 16], sizes = [8, 8], strides = [1, 1]} : vector<16x32xf32> to vector<8x8xf32>
    %252 = vector.extract_strided_slice %214 {offsets = [0, 24], sizes = [8, 8], strides = [1, 1]} : vector<16x32xf32> to vector<8x8xf32>
    %253 = vector.extract_strided_slice %214 {offsets = [8, 0], sizes = [8, 8], strides = [1, 1]} : vector<16x32xf32> to vector<8x8xf32>
    %254 = vector.extract_strided_slice %214 {offsets = [8, 8], sizes = [8, 8], strides = [1, 1]} : vector<16x32xf32> to vector<8x8xf32>
    %255 = vector.extract_strided_slice %214 {offsets = [8, 16], sizes = [8, 8], strides = [1, 1]} : vector<16x32xf32> to vector<8x8xf32>
    %256 = vector.extract_strided_slice %214 {offsets = [8, 24], sizes = [8, 8], strides = [1, 1]} : vector<16x32xf32> to vector<8x8xf32>
    %257 = vector.shape_cast %249 : vector<8x8xf32> to vector<1x8x8xf32>
    %258 = vector.shape_cast %250 : vector<8x8xf32> to vector<1x8x8xf32>
    %259 = vector.shape_cast %251 : vector<8x8xf32> to vector<1x8x8xf32>
    %260 = vector.shape_cast %252 : vector<8x8xf32> to vector<1x8x8xf32>
    %261 = vector.shape_cast %253 : vector<8x8xf32> to vector<1x8x8xf32>
    %262 = vector.shape_cast %254 : vector<8x8xf32> to vector<1x8x8xf32>
    %263 = vector.shape_cast %255 : vector<8x8xf32> to vector<1x8x8xf32>
    %264 = vector.shape_cast %256 : vector<8x8xf32> to vector<1x8x8xf32>
    %265 = tpu.concatenate %257, %258, %259, %260, %261, %262, %263, %264 in 0 : vector<1x8x8xf32>, vector<1x8x8xf32>, vector<1x8x8xf32>, vector<1x8x8xf32>, vector<1x8x8xf32>, vector<1x8x8xf32>, vector<1x8x8xf32>, vector<1x8x8xf32> -> vector<8x8x8xf32>
    %cst_79 = arith.constant dense<0.000000e+00> : vector<8x8x8xf32>
    %266 = tpu.matmul %231, %248, %cst_79 {dimension_numbers = #tpu.dot_dimension_numbers<[2], [2], [1], [1], [0, 0, 0, 1, 1, 1], [0], [0]>} : vector<8x8x8xf32>, vector<8x8x8xf32>, vector<8x8x8xf32> -> vector<8x8x8xf32>
    %267 = vector.shape_cast %8 : vector<8x8xf32> to vector<1x8x8xf32>
    %268 = vector.broadcast %267 : vector<1x8x8xf32> to vector<8x8x8xf32>
    %269 = arith.addf %266, %268 : vector<8x8x8xf32>
    %cst_80 = arith.constant dense<0xFF800000> : vector<8x8xf32>
    %270 = vector.multi_reduction <maximumf>, %269, %cst_80 [2] : vector<8x8x8xf32> to vector<8x8xf32>
    %271 = vector.shape_cast %270 : vector<8x8xf32> to vector<8x8x1xf32>
    %272 = vector.broadcast %271 : vector<8x8x1xf32> to vector<8x8x8xf32>
    %273 = arith.subf %269, %272 : vector<8x8x8xf32>
    %274 = math.exp %273 : vector<8x8x8xf32>
    %cst_81 = arith.constant dense<0.000000e+00> : vector<8x8xf32>
    %275 = vector.multi_reduction <add>, %274, %cst_81 [2] : vector<8x8x8xf32> to vector<8x8xf32>
    %276 = vector.shape_cast %275 : vector<8x8xf32> to vector<8x8x1xf32>
    %277 = tpu.reciprocal %276 {approx = true} : vector<8x8x1xf32> -> vector<8x8x1xf32>
    %278 = vector.broadcast %277 : vector<8x8x1xf32> to vector<8x8x8xf32>
    %279 = arith.mulf %274, %278 : vector<8x8x8xf32>
    %cst_82 = arith.constant dense<0.000000e+00> : vector<8x8x8xf32>
    %280 = tpu.matmul %279, %265, %cst_82 {dimension_numbers = #tpu.dot_dimension_numbers<[2], [1], [1], [2], [0, 0, 0, 1, 1, 2], [0], [0]>} : vector<8x8x8xf32>, vector<8x8x8xf32>, vector<8x8x8xf32> -> vector<8x8x8xf32>
    %281 = vector.extract_strided_slice %280 {offsets = [0, 0, 0], sizes = [1, 8, 8], strides = [1, 1, 1]} : vector<8x8x8xf32> to vector<1x8x8xf32>
    %282 = vector.shape_cast %281 : vector<1x8x8xf32> to vector<8x8xf32>
    %283 = vector.extract_strided_slice %280 {offsets = [1, 0, 0], sizes = [1, 8, 8], strides = [1, 1, 1]} : vector<8x8x8xf32> to vector<1x8x8xf32>
    %284 = vector.shape_cast %283 : vector<1x8x8xf32> to vector<8x8xf32>
    %285 = vector.extract_strided_slice %280 {offsets = [2, 0, 0], sizes = [1, 8, 8], strides = [1, 1, 1]} : vector<8x8x8xf32> to vector<1x8x8xf32>
    %286 = vector.shape_cast %285 : vector<1x8x8xf32> to vector<8x8xf32>
    %287 = vector.extract_strided_slice %280 {offsets = [3, 0, 0], sizes = [1, 8, 8], strides = [1, 1, 1]} : vector<8x8x8xf32> to vector<1x8x8xf32>
    %288 = vector.shape_cast %287 : vector<1x8x8xf32> to vector<8x8xf32>
    %289 = tpu.concatenate %282, %284, %286, %288 in 1 : vector<8x8xf32>, vector<8x8xf32>, vector<8x8xf32>, vector<8x8xf32> -> vector<8x32xf32>
    %290 = vector.extract_strided_slice %280 {offsets = [4, 0, 0], sizes = [1, 8, 8], strides = [1, 1, 1]} : vector<8x8x8xf32> to vector<1x8x8xf32>
    %291 = vector.shape_cast %290 : vector<1x8x8xf32> to vector<8x8xf32>
    %292 = vector.extract_strided_slice %280 {offsets = [5, 0, 0], sizes = [1, 8, 8], strides = [1, 1, 1]} : vector<8x8x8xf32> to vector<1x8x8xf32>
    %293 = vector.shape_cast %292 : vector<1x8x8xf32> to vector<8x8xf32>
    %294 = vector.extract_strided_slice %280 {offsets = [6, 0, 0], sizes = [1, 8, 8], strides = [1, 1, 1]} : vector<8x8x8xf32> to vector<1x8x8xf32>
    %295 = vector.shape_cast %294 : vector<1x8x8xf32> to vector<8x8xf32>
    %296 = vector.extract_strided_slice %280 {offsets = [7, 0, 0], sizes = [1, 8, 8], strides = [1, 1, 1]} : vector<8x8x8xf32> to vector<1x8x8xf32>
    %297 = vector.shape_cast %296 : vector<1x8x8xf32> to vector<8x8xf32>
    %298 = tpu.concatenate %291, %293, %295, %297 in 1 : vector<8x8xf32>, vector<8x8xf32>, vector<8x8xf32>, vector<8x8xf32> -> vector<8x32xf32>
    %299 = tpu.concatenate %289, %298 in 0 : vector<8x32xf32>, vector<8x32xf32> -> vector<16x32xf32>
    %cst_83 = arith.constant dense<0.000000e+00> : vector<16x32xf32>
    %300 = tpu.matmul %299, %179, %cst_83 {dimension_numbers = #tpu.dot_dimension_numbers<[1], [0], [0], [1], [0, 0, 1, 1], [], []>} : vector<16x32xf32>, vector<32x32xf32>, vector<16x32xf32> -> vector<16x32xf32>
    %301 = vector.broadcast %180 : vector<1x32xf32> to vector<16x32xf32>
    %302 = arith.addf %300, %301 : vector<16x32xf32>
    %303 = arith.addf %174, %302 : vector<16x32xf32>
    %cst_84 = arith.constant dense<0.000000e+00> : vector<16xf32>
    %304 = vector.multi_reduction <add>, %303, %cst_84 [1] : vector<16x32xf32> to vector<16xf32>
    %305 = vector.shape_cast %304 : vector<16xf32> to vector<16x1xf32>
    %cst_85 = arith.constant 3.200000e+01 : f32
    %306 = vector.broadcast %cst_85 : f32 to vector<16x1xf32>
    %307 = arith.divf %305, %306 : vector<16x1xf32>
    %308 = vector.broadcast %307 : vector<16x1xf32> to vector<16x32xf32>
    %309 = arith.subf %303, %308 : vector<16x32xf32>
    %310 = arith.mulf %309, %309 : vector<16x32xf32>
    %cst_86 = arith.constant dense<0.000000e+00> : vector<16xf32>
    %311 = vector.multi_reduction <add>, %310, %cst_86 [1] : vector<16x32xf32> to vector<16xf32>
    %312 = vector.shape_cast %311 : vector<16xf32> to vector<16x1xf32>
    %cst_87 = arith.constant 3.200000e+01 : f32
    %313 = vector.broadcast %cst_87 : f32 to vector<16x1xf32>
    %314 = arith.divf %312, %313 : vector<16x1xf32>
    %315 = vector.broadcast %307 : vector<16x1xf32> to vector<16x32xf32>
    %316 = arith.subf %303, %315 : vector<16x32xf32>
    %cst_88 = arith.constant 9.99999974E-6 : f32
    %317 = vector.broadcast %cst_88 : f32 to vector<16x1xf32>
    %318 = arith.addf %314, %317 : vector<16x1xf32>
    %319 = math.rsqrt %318 : vector<16x1xf32>
    %320 = vector.broadcast %319 : vector<16x1xf32> to vector<16x32xf32>
    %321 = arith.mulf %316, %320 : vector<16x32xf32>
    %322 = vector.broadcast %181 : vector<1x32xf32> to vector<16x32xf32>
    %323 = arith.mulf %321, %322 : vector<16x32xf32>
    %324 = vector.broadcast %182 : vector<1x32xf32> to vector<16x32xf32>
    %325 = arith.addf %323, %324 : vector<16x32xf32>
    %cst_89 = arith.constant dense<0.000000e+00> : vector<16x128xf32>
    %326 = tpu.matmul %325, %183, %cst_89 {dimension_numbers = #tpu.dot_dimension_numbers<[1], [0], [0], [1], [0, 0, 1, 1], [], []>} : vector<16x32xf32>, vector<32x128xf32>, vector<16x128xf32> -> vector<16x128xf32>
    %327 = vector.broadcast %184 : vector<1x128xf32> to vector<16x128xf32>
    %328 = arith.addf %326, %327 : vector<16x128xf32>
    %cst_90 = arith.constant -1.702000e+00 : f32
    %329 = vector.broadcast %cst_90 : f32 to vector<16x128xf32>
    %330 = arith.mulf %329, %328 : vector<16x128xf32>
    %331 = math.exp %330 : vector<16x128xf32>
    %cst_91 = arith.constant 1.000000e+00 : f32
    %332 = vector.broadcast %cst_91 : f32 to vector<16x128xf32>
    %333 = arith.addf %332, %331 : vector<16x128xf32>
    %cst_92 = arith.constant 1.000000e+00 : f32
    %334 = vector.broadcast %cst_92 : f32 to vector<16x128xf32>
    %335 = arith.divf %334, %333 : vector<16x128xf32>
    %336 = arith.mulf %328, %335 : vector<16x128xf32>
    %cst_93 = arith.constant dense<0.000000e+00> : vector<16x32xf32>
    %337 = tpu.matmul %336, %185, %cst_93 {dimension_numbers = #tpu.dot_dimension_numbers<[1], [0], [0], [1], [0, 0, 1, 1], [], []>} : vector<16x128xf32>, vector<128x32xf32>, vector<16x32xf32> -> vector<16x32xf32>
    %338 = vector.broadcast %186 : vector<1x32xf32> to vector<16x32xf32>
    %339 = arith.addf %337, %338 : vector<16x32xf32>
    %340 = arith.addf %303, %339 : vector<16x32xf32>
    %c0_94 = arith.constant 0 : index
    %c0_95 = arith.constant 0 : index
    %341 = vector.load %arg31[%c0_94, %c0_95] : memref<16x32xf32, #tpu.memory_space<vmem>>, vector<16x32xf32>
    tpu.vector_store %arg31[%c0_94, %c0_95], %340 {strides = array<i32>} : memref<16x32xf32, #tpu.memory_space<vmem>>, vector<16x32xf32>,
    %c0_96 = arith.constant 0 : index
    %342 = memref.load %arg0[%c0_96] : memref<2xi32, #tpu.memory_space<smem>>
    %c0_i32 = arith.constant 0 : i32
    %343 = arith.addi %342, %c0_i32 : i32
    %344 = arith.index_cast %343 : i32 to index
    %c0_97 = arith.constant 0 : index
    %345 = vector.load %arg31[%344, %c0_97] : memref<16x32xf32, #tpu.memory_space<vmem>>, vector<1x32xf32>
    %c1 = arith.constant 1 : index
    %346 = memref.load %arg0[%c1] : memref<2xi32, #tpu.memory_space<smem>>
    %c8_i32 = arith.constant 8 : i32
    %347 = arith.addi %346, %c8_i32 : i32
    %348 = arith.index_cast %347 : i32 to index
    %c0_98 = arith.constant 0 : index
    %349 = vector.load %arg31[%348, %c0_98] : memref<16x32xf32, #tpu.memory_space<vmem>>, vector<1x32xf32>
    %350 = tpu.concatenate %345, %349 in 0 : vector<1x32xf32>, vector<1x32xf32> -> vector<2x32xf32>
    %c0_99 = arith.constant 0 : index
    %c0_100 = arith.constant 0 : index
    %351 = vector.load %arg27[%c0_99, %c0_100] : memref<1x32xf32, #tpu.memory_space<vmem>>, vector<1x32xf32>
    %c0_101 = arith.constant 0 : index
    %c0_102 = arith.constant 0 : index
    %352 = vector.load %arg28[%c0_101, %c0_102] : memref<1x32xf32, #tpu.memory_space<vmem>>, vector<1x32xf32>
    %cst_103 = arith.constant dense<0.000000e+00> : vector<2xf32>
    %353 = vector.multi_reduction <add>, %350, %cst_103 [1] : vector<2x32xf32> to vector<2xf32>
    %354 = vector.shape_cast %353 : vector<2xf32> to vector<2x1xf32>
    %cst_104 = arith.constant 3.200000e+01 : f32
    %355 = vector.broadcast %cst_104 : f32 to vector<2x1xf32>
    %356 = arith.divf %354, %355 : vector<2x1xf32>
    %357 = vector.broadcast %356 : vector<2x1xf32> to vector<2x32xf32>
    %358 = arith.subf %350, %357 : vector<2x32xf32>
    %359 = arith.mulf %358, %358 : vector<2x32xf32>
    %cst_105 = arith.constant dense<0.000000e+00> : vector<2xf32>
    %360 = vector.multi_reduction <add>, %359, %cst_105 [1] : vector<2x32xf32> to vector<2xf32>
    %361 = vector.shape_cast %360 : vector<2xf32> to vector<2x1xf32>
    %cst_106 = arith.constant 3.200000e+01 : f32
    %362 = vector.broadcast %cst_106 : f32 to vector<2x1xf32>
    %363 = arith.divf %361, %362 : vector<2x1xf32>
    %364 = vector.broadcast %356 : vector<2x1xf32> to vector<2x32xf32>
    %365 = arith.subf %350, %364 : vector<2x32xf32>
    %cst_107 = arith.constant 9.99999974E-6 : f32
    %366 = vector.broadcast %cst_107 : f32 to vector<2x1xf32>
    %367 = arith.addf %363, %366 : vector<2x1xf32>
    %368 = math.rsqrt %367 : vector<2x1xf32>
    %369 = vector.broadcast %368 : vector<2x1xf32> to vector<2x32xf32>
    %370 = arith.mulf %365, %369 : vector<2x32xf32>
    %371 = vector.broadcast %351 : vector<1x32xf32> to vector<2x32xf32>
    %372 = arith.mulf %370, %371 : vector<2x32xf32>
    %373 = vector.broadcast %352 : vector<1x32xf32> to vector<2x32xf32>
    %374 = arith.addf %372, %373 : vector<2x32xf32>
    %c0_108 = arith.constant 0 : index
    %c0_109 = arith.constant 0 : index
    %375 = vector.load %arg29[%c0_108, %c0_109] : memref<32x32xf32, #tpu.memory_space<vmem>>, vector<32x32xf32>
    %cst_110 = arith.constant dense<0.000000e+00> : vector<2x32xf32>
    %376 = tpu.matmul %374, %375, %cst_110 {dimension_numbers = #tpu.dot_dimension_numbers<[1], [0], [0], [1], [0, 0, 1, 1], [], []>} : vector<2x32xf32>, vector<32x32xf32>, vector<2x32xf32> -> vector<2x32xf32>
    %c0_111 = arith.constant 0 : index
    %c0_112 = arith.constant 0 : index
    %377 = vector.load %arg30[%c0_111, %c0_112] : memref<2x32xf32, #tpu.memory_space<vmem>>, vector<2x32xf32>
    tpu.vector_store %arg30[%c0_111, %c0_112], %376 {strides = array<i32>} : memref<2x32xf32, #tpu.memory_space<vmem>>, vector<2x32xf32>,
    return
  }
}

</mosaic_0001>

<bundles_post_ra>
// kernel: tpu_custom_call.1
= control target key start
LH: loop header
LB: loop body
LE: loop exit
PB: predicated region body
PF: predicated region fallthrough
CT: control target
= control target key end

     0   :  { %s2297_s6 = smov 1   ;;  %s2298_s10 = smov 2   ;;  %s2985_s0 = inlined_call_operand.smem [shape: u32[31], index: -1, kind: input, shape index: {}] }
   0x1   :  { %s2347_s5 = sld [smem:[%s2985_s0]]   ;;  %s2299_s14 = smov 3  }
   0x2   :  { %s2352_s9 = sld [smem:[%s2985_s0 + %s2297_s6]]   ;;  %s2300_s18 = smov 4  }
   0x3   :  { %s2357_s13 = sld [smem:[%s2985_s0 + %s2298_s10]]   ;;  %s2301_s22 = smov 5  }
   0x4   :  { %s2362_s17 = sld [smem:[%s2985_s0 + %s2299_s14]]   ;;  %s2302_s26 = smov 6  }
   0x5   :  { %s2367_s21 = sld [smem:[%s2985_s0 + %s2300_s18]]   ;;  %s2303_s30 = smov 7  }
   0x6   :  { %s2372_s25 = sld [smem:[%s2985_s0 + %s2301_s22]]   ;;  %s2304_s4 = smov 8  }
   0x7   :  { %s2377_s29 = sld [smem:[%s2985_s0 + %s2302_s26]]   ;;  %s2305_s10 = smov 9  }
   0x8   :  { %s2382_s3 = sld [smem:[%s2985_s0 + %s2303_s30]]   ;;  %s2306_s15 = smov 10  }
   0x9   :  { %s2387_s8 = sld [smem:[%s2985_s0 + %s2304_s4]]   ;;  %s2307_s20 = smov 11  }
   0xa   :  { %s2392_s14 = sld [smem:[%s2985_s0 + %s2305_s10]]   ;;  %s2308_s26 = smov 12  }
   0xb   :  { %s2397_s19 = sld [smem:[%s2985_s0 + %s2306_s15]]   ;;  %s2309_s1 = smov 13  }
   0xc   :  { %s2402_s24 = sld [smem:[%s2985_s0 + %s2307_s20]]   ;;  %s2310_s7 = smov 14  }
   0xd   :  { %s2407_s30 = sld [smem:[%s2985_s0 + %s2308_s26]]   ;;  %s2311_s15 = smov 15  }
   0xe   :  { %s2412_s6 = sld [smem:[%s2985_s0 + %s2309_s1]]   ;;  %s2312_s22 = smov 16  }
   0xf   :  { %s2417_s12 = sld [smem:[%s2985_s0 + %s2310_s7]]   ;;  %s2313_s28 = smov 17  }
  0x10   :  { %s2422_s20 = sld [smem:[%s2985_s0 + %s2311_s15]]   ;;  %s2314_s7 = smov 18  }
  0x11   :  { %s2427_s27 = sld [smem:[%s2985_s0 + %s2312_s22]]   ;;  %s2315_s15 = smov 19  }
  0x12   :  { %s2432_s4 = sld [smem:[%s2985_s0 + %s2313_s28]]   ;;  %s2316_s22 = smov 20  }
  0x13   :  { %s2317_s28 = smov 21  }
  0x15   :  { %2990 = sst [smem:[#allocation9_spill]] %s2417_s12 }
  0x16   :  { %2991 = sst [smem:[#allocation10_spill]] %s2422_s20 }
  0x17   :  { %2992 = sst [smem:[#allocation11_spill]] %s2427_s27 }
  0x18   :  { %2993 = sst [smem:[#allocation12_spill]] %s2432_s4 }
  0x19   :  { %s2437_s12 = sld [smem:[%s2985_s0 + %s2314_s7]]   ;;  %s2318_s7 = smov 22  }
  0x1a   :  { %s2442_s20 = sld [smem:[%s2985_s0 + %s2315_s15]]   ;;  %s2319_s15 = smov 23  }
  0x1b   :  { %s2447_s27 = sld [smem:[%s2985_s0 + %s2316_s22]]   ;;  %s2320_s22 = smov 24  }
  0x1c   :  { %s2452_s4 = sld [smem:[%s2985_s0 + %s2317_s28]]   ;;  %s2321_s28 = smov 25  }
  0x1f   :  { %2994 = sst [smem:[#allocation13_spill]] %s2437_s12 }
  0x20   :  { %2995 = sst [smem:[#allocation14_spill]] %s2442_s20 }
  0x21   :  { %2996 = sst [smem:[#allocation15_spill]] %s2447_s27 }
  0x22   :  { %2997 = sst [smem:[#allocation16_spill]] %s2452_s4 }
  0x23   :  { %s2457_s12 = sld [smem:[%s2985_s0 + %s2318_s7]]   ;;  %s2322_s7 = smov 26  }
  0x24   :  { %s2462_s20 = sld [smem:[%s2985_s0 + %s2319_s15]]   ;;  %s2323_s15 = smov 27  }
  0x25   :  { %s2467_s27 = sld [smem:[%s2985_s0 + %s2320_s22]]   ;;  %s2324_s22 = smov 28  }
  0x26   :  { %s2472_s4 = sld [smem:[%s2985_s0 + %s2321_s28]]   ;;  %s2325_s28 = smov 29  }
  0x29   :  { %2998 = sst [smem:[#allocation17_spill]] %s2457_s12 }
  0x2a   :  { %2999 = sst [smem:[#allocation18_spill]] %s2462_s20 }
  0x2b   :  { %3000 = sst [smem:[#allocation19_spill]] %s2467_s27 }
  0x2c   :  { %3001 = sst [smem:[#allocation20_spill]] %s2472_s4 }
  0x2d   :  { %s2477_s12 = sld [smem:[%s2985_s0 + %s2322_s7]]   ;;  %s2326_s7 = smov 30  }
  0x2e   :  { %s2482_s20 = sld [smem:[%s2985_s0 + %s2323_s15]]  }
  0x2f   :  { %s2487_s27 = sld [smem:[%s2985_s0 + %s2324_s22]]  }
  0x30   :  { %s2492_s4 = sld [smem:[%s2985_s0 + %s2325_s28]]  }
  0x33   :  { %3002 = sst [smem:[#allocation21_spill]] %s2477_s12 }
  0x34   :  { %s2497_s12 = sld [smem:[%s2985_s0 + %s2326_s7]]  }
  0x35   :  { %66 = vsyncpa [#allocation5], 0 }
  0x36   :  { %67 = vsyncpa [#allocation4], 0  ;;  %s73_s15 = sshll.u32 %s2347_s5, 4  ;;  %s2261_s22 = scalar_lea.vmem %s2347_s5, 1  ;;  %s74_s15 = int_to_ptr.vmem [resolvable:$true] %s73_s15 }
  0x37   :  { %s2257_s16 = sshra.s32 %s74_s15, 4  ;;  %s2258_s16 = int_to_ptr.vmem [resolvable:$true] %s2257_s16 }
  0x38   :  { %s2259_s18 = scalar_lea.vmem %s2258_s16, 1  ;;  %p2262_p1 = scmp.lt.s32.totalorder %s2258_s16, %s2347_s5 }
  0x39   :  { %p2260_p0 = scmp.ne.s32.totalorder %s2258_s16, %s2259_s18  ;;  %p2263_p2 = scmp.lt.s32.totalorder %s2261_s22, %s2259_s18 }
  0x3b   :  { %p2264_p3 = por %p2263_p2, %p2262_p1 }
  0x3d   :  { %p2265_p4 = pnand %p2264_p3, %p2260_p0 }
  0x3f   :  { %2268 = shalt.err (!%p2265_p4)
}
  0x40   :  { %s2327_s23 = smov [#allocation3]  }
  0x41   :  { %76 = dma.vmem_to_smem %s74_s15, 16, %s2327_s23, [#allocation5]  }
  0x42   :  { %2293 = dma.done.wait [#allocation5], 16  }
  0x43   :  { %2294 = vsyncadd [#allocation5], 4294967280 }
  0x44   :  { %139 = sfence }
  0x45   :  { %v140_v0 = vld [vmem:[%s2352_s9] sm:$0xff]  ;;  %vm188_vm0 = vcmask 261120   ;;  %v141_v2 = vld [vmem:[%s2352_s9 + $0x8] sm:$0xff]  ;;  %v2328_v8 = vmov 32.0   ;;  %v157_v25 = vld [vmem:[%s2372_s25 + $0x18] sm:$0xff]  ;;  %s2329_s0 = smov 104  }
  0x46   :  { %v142_v1 = vld [vmem:[%s2357_s13] sm:$0xff]  ;;  %v143_v4 = vld [vmem:[%s2357_s13 + $0x8] sm:$0xff]  ;;  %2157 = vrcp.f32 %v2328_v8  ;;  %271 = vmatpush.msra.mxu0 %v157_v25  ;;  %v156_v26 = vld [vmem:[%s2372_s25 + $0x10] sm:$0xff]  ;;  %s2330_s5 = smov 120   ;;  %s2331_s9 = smov 96   ;;  %vm298_vm8 = vcmask 64512  }
  0x47   :  { %v2505_v3 = vadd.f32 %v142_v1, %v140_v0  ;;  %v2510_v6 = vadd.f32 %v143_v4, %v141_v2  ;;  %v155_v27 = vld [vmem:[%s2372_s25 + $0x8] sm:$0xff]  ;;  %v154_v28 = vld [vmem:[%s2372_s25] sm:$0xff]  ;;  %s2332_s13 = smov 112   ;;  %s2336_s25 = smov 24   ;;  %vm814_vm10 = vcmask 130048   ;;  %vm816_vm11 = vcmask 195584  }
  0x48   :  { %272 = vmatpush.msra.mxu0 %v156_v26  ;;  %v2139_v43 = vld [vmem:[%s2362_s17] ss:$0 sm:$0xff]  ;;  %s2334_s17 = smov 64   ;;  %s3010_s26 = sld [smem:[#allocation18_spill]] }
  0x49   :  { %v189_v5 = vsel %vm188_vm0, %v2505_v3, 0.0  ;;  %v192_v7 = vsel %vm188_vm0, %v2510_v6, 0.0  ;;  %v2140_v47 = vld [vmem:[%s2367_s21] ss:$0 sm:$0xff]  ;;  %s2335_s21 = smov 8   ;;  %s3011_s28 = sld [smem:[#allocation16_spill]] }
  0x4a   :  { %190 = vadd.xlane.f32.xlu0 %v189_v5  ;;  %273 = vmatpush.msra.mxu0 %v155_v27  ;;  %v2141_v57 = vld [vmem:[%s2377_s29] ss:$0 sm:$0xff]  ;;  %s2337_s29 = smov 16   ;;  %s3012_s1 = sld [smem:[#allocation17_spill]] }
  0x4b   :  { %s3013_s2 = sld [smem:[#allocation20_spill]]  ;;  %s1961_s23 = sshll.u32 %s2497_s12, 4  ;;  %s1962_s23 = int_to_ptr.hbm [resolvable:$true] %s1961_s23 }
  0x4c   :  { %v2158_v9 = vpop.eup %2157  ;;  %274 = vmatpush.msra.mxu0 %v154_v28  ;;  %s3014_s7 = sld [smem:[#allocation19_spill]] }
  0x4d   :  { %v196_v10 = vmul.f32 32.0, %v2158_v9  ;;  %vm200_vm1 = vweird.f32 %v2158_v9  ;;  %s3015_s10 = sld [smem:[#allocation21_spill]] }
  0x4e   :  { %s2064_s11 = sld [smem:[#allocation3 + $0x1]] }
  0x4f   :  { %v197_v11 = vsub.f32 1.0, %v196_v10  ;;  %s1881_s15 = sld [smem:[#allocation3]] }
  0x51   :  { %v198_v12 = vmul.f32 %v2158_v9, %v197_v11 }
  0x52   :  { %193 = vadd.xlane.f32.xlu0 %v192_v7 }
  0x53   :  { %v199_v13 = vadd.f32 %v2158_v9, %v198_v12 }
  0x54   :  { %s1972_s16 = scalar_lea.vmem [#allocation2], %s2064_s11 }
  0x55   :  { %v2514_v14 = vsel %vm200_vm1, %v2158_v9, %v199_v13  ;;  %s1882_s18 = scalar_lea.vmem [#allocation2], %s1881_s15 }
  0xbd   :  { %v191_v15 = vpop.xlane.xlu0 %190 }
  0xbe   :  { %v202_v16 = vmul.f32 %v2514_v14, %v191_v15  ;;  %v146_v15 = vlaneseq }
  0xc0   :  { %v204_v17 = vsub.f32 %v2505_v3, %v202_v16  ;;  %v147_v16 = vshrl.u32 %v146_v15, 7 }
  0xc2   :  { %v206_v18 = vmul.f32 %v204_v17, %v204_v17 }
  0xc4   :  { %v208_v19 = vsel %vm188_vm0, %v206_v18, 0.0  ;;  %v2333_v18 = vmov -1e+30  }
  0xc5   :  { %209 = vadd.xlane.f32.xlu1 %v208_v19  ;;  %v194_v20 = vpop.xlane.xlu0 %193 }
  0xc6   :  { %v203_v21 = vmul.f32 %v2514_v14, %v194_v20 }
  0xc8   :  { %v205_v22 = vsub.f32 %v2510_v6, %v203_v21 }
  0xca   :  { %v207_v23 = vmul.f32 %v205_v22, %v205_v22 }
  0xcc   :  { %v211_v24 = vsel %vm188_vm0, %v207_v23, 0.0 }
  0xcd   :  { %212 = vadd.xlane.f32.xlu1 %v211_v24 }
 0x138   :  { %v210_v29 = vpop.xlane.xlu1 %209 }
 0x139   :  { %v214_v30 = vmul.f32 %v210_v29, %v2514_v14 }
 0x13b   :  { %v216_v31 = vadd.f32 1e-05, %v214_v30 }
 0x13d   :  { %2159 = vrsqrt.f32 %v216_v31  ;;  %vm224_vm3 = vweird.f32 %v216_v31 }
 0x140   :  { %v213_v32 = vpop.xlane.xlu1 %212 }
 0x141   :  { %v215_v33 = vmul.f32 %v213_v32, %v2514_v14 }
 0x143   :  { %v2160_v34 = vpop.eup %2159  ;;  %v217_v35 = vadd.f32 1e-05, %v215_v33 }
 0x144   :  { %v219_v36 = vmul.f32 %v2160_v34, %v216_v31  ;;  %vm225_vm2 = vweird.f32 %v2160_v34 }
 0x145   :  { %2161 = vrsqrt.f32 %v217_v35  ;;  %vm226_vm4 = vmor %vm224_vm3, %vm225_vm2  ;;  %vm234_vm5 = vweird.f32 %v217_v35 }
 0x146   :  { %v220_v37 = vmul.f32 %v2160_v34, %v219_v36 }
 0x148   :  { %v221_v38 = vmul.f32 0.5, %v220_v37 }
 0x14a   :  { %v222_v39 = vsub.f32 1.5, %v221_v38 }
 0x14b   :  { %v2162_v40 = vpop.eup %2161 }
 0x14c   :  { %v223_v41 = vmul.f32 %v2160_v34, %v222_v39  ;;  %v229_v42 = vmul.f32 %v2162_v40, %v217_v35  ;;  %vm235_vm6 = vweird.f32 %v2162_v40 }
 0x14d   :  { %vm236_vm7 = vmor %vm234_vm5, %vm235_vm6 }
 0x14e   :  { %v227_v44 = vsel %vm226_vm4, %v2160_v34, %v223_v41  ;;  %v230_v45 = vmul.f32 %v2162_v40, %v229_v42 }
 0x14f   :  { %v238_v46 = vmul.f32 %v227_v44, %v204_v17  ;;  %v149_v17 = vand.u32 127, %v146_v15 }
 0x150   :  { %v231_v48 = vmul.f32 0.5, %v230_v45 }
 0x151   :  { %v243_v49 = vmul.f32 %v2139_v43, %v238_v46  ;;  %vm150_vm9 = vcmp.le.s32.totalorder %v149_v17, %v147_v16 }
 0x152   :  { %v232_v50 = vsub.f32 1.5, %v231_v48  ;;  %v2601_v19 = vsel %vm150_vm9, 0.0, %v2333_v18 }
 0x153   :  { %v248_v51 = vadd.f32 %v2140_v47, %v243_v49 }
 0x154   :  { %v233_v52 = vmul.f32 %v2162_v40, %v232_v50 }
 0x155   :  { %2004 = vmatmul.msk.f32.vlgmr.msra.gmra.mxu0 %vm188_vm0, %v248_v51 }
 0x156   :  { %v237_v53 = vsel %vm236_vm7, %v2162_v40, %v233_v52 }
 0x157   :  { %v239_v54 = vmul.f32 %v237_v53, %v205_v22 }
 0x159   :  { %v244_v55 = vmul.f32 %v2139_v43, %v239_v54 }
 0x15b   :  { %v249_v56 = vadd.f32 %v2140_v47, %v244_v55 }
 0x15d   :  { %2005 = vmatmul.msk.f32.gmra.mxu0 %vm188_vm0, %v249_v56 }
 0x1d2   :  { %v276_v58 = vpop.f32.mrf.mxu0 }
 0x1d3   :  { %v2533_v59 = vadd.f32 %v2141_v57, %v276_v58 }
 0x1d5   :  { %287 = vrot.lane.b32.xlu0 %v2533_v59, %s2329_s0  ;;  %283 = vrot.lane.b32.xlu2 %v2533_v59, %s2330_s5 }
 0x1da   :  { %v279_v60 = vpop.f32.mrf.mxu0 }
 0x1db   :  { %v2539_v61 = vadd.f32 %v2141_v57, %v279_v60 }
 0x1dd   :  { %296 = vrot.lane.b32.xlu0 %v2533_v59, %s2331_s9  ;;  %285 = vrot.lane.b32.xlu2 %v2533_v59, %s2332_s13 }
 0x1de   :  { %294 = vrot.lane.b32.xlu1 %v2539_v61, %s2329_s0 }
 0x1e5   :  { %290 = vrot.lane.b32.xlu2 %v2539_v61, %s2330_s5 }
 0x1ed   :  { %292 = vrot.lane.b32.xlu2 %v2539_v61, %s2332_s13 }
 0x22f   :  { %v2551_v62 = vpop.permute.xlu2 %283 }
 0x230   :  { %323 = vrot.lane.b32.xlu2 %v2551_v62, %s2331_s9 }
 0x237   :  { %v2555_v63 = vpop.permute.xlu2 %285 }
 0x238   :  { %401 = vrot.lane.b32.xlu2 %v2539_v61, %s2331_s9  ;;  %349 = vrot.lane.b32.xlu1 %v2555_v63, %s2331_s9 }
 0x23f   :  { %v2561_v0 = vpop.permute.xlu2 %290 }
 0x240   :  { %427 = vrot.lane.b32.xlu1 %v2561_v0, %s2331_s9 }
 0x247   :  { %v2565_v1 = vpop.permute.xlu0 %287  ;;  %v2569_v2 = vpop.permute.xlu2 %292 }
 0x248   :  { %375 = vrot.lane.b32.xlu0 %v2565_v1, %s2331_s9  ;;  %v2109_v53 = vpack.i.bf16 %v2565_v1, %v2551_v62 }
 0x24f   :  { %v297_v4 = vpop.permute.xlu0 %296 }
 0x250   :  { %v2571_v5 = vpop.permute.xlu1 %294  ;;  %453 = vrot.lane.b32.xlu0 %v2569_v2, %s2331_s9  ;;  %2006 = vmatpush.xpose.msk.msra.mxu1 %vm298_vm8, %v297_v4 }
 0x251   :  { %479 = vrot.lane.b32.xlu2 %v2571_v5, %s2331_s9 }
 0x253   :  { %2007 = vmatmul.msk.f32.vlgmr.msra.gmra.mxu1 %vm298_vm8, %v2533_v59 }
 0x28a   :  { %v324_v7 = vpop.permute.xlu2 %323 }
 0x28b   :  { %2008 = vmatpush.xpose.msk.msra.mxu2 %vm298_vm8, %v324_v7 }
 0x28e   :  { %2009 = vmatmul.msk.f32.vlgmr.msra.gmra.mxu2 %vm298_vm8, %v2551_v62 }
 0x292   :  { %v402_v8 = vpop.permute.xlu2 %401 }
 0x293   :  { %2014 = vmatpush.xpose.msk.msrb.mxu2 %vm298_vm8, %v402_v8 }
 0x296   :  { %2015 = vmatmul.msk.f32.vlgmr.msrb.gmra.mxu2 %vm298_vm8, %v2539_v61 }
 0x2aa   :  { %v350_v9 = vpop.permute.xlu1 %349 }
 0x2ab   :  { %v480_v10 = vpop.permute.xlu2 %479  ;;  %2010 = vmatpush.xpose.msk.msra.mxu3 %vm298_vm8, %v350_v9 }
 0x2ac   :  { %2020 = vmatpush.xpose.msk.msra.mxu2 %vm298_vm8, %v480_v10 }
 0x2ae   :  { %2011 = vmatmul.msk.f32.vlgmr.msra.gmra.mxu3 %vm298_vm8, %v2555_v63 }
 0x2af   :  { %2021 = vmatmul.msk.f32.vlgmr.msra.gmra.mxu2 %vm298_vm8, %v2571_v5 }
 0x2b2   :  { %v428_v11 = vpop.permute.xlu1 %427 }
 0x2b3   :  { %2016 = vmatpush.xpose.msk.msrb.mxu3 %vm298_vm8, %v428_v11 }
 0x2b6   :  { %2017 = vmatmul.msk.f32.vlgmr.msrb.gmra.mxu3 %vm298_vm8, %v2561_v0 }
 0x2ba   :  { %v376_v12 = vpop.permute.xlu0 %375 }
 0x2bb   :  { %2012 = vmatpush.xpose.msk.msrb.mxu1 %vm298_vm8, %v376_v12 }
 0x2be   :  { %2013 = vmatmul.msk.f32.vlgmr.msrb.gmra.mxu1 %vm298_vm8, %v2565_v1 }
 0x2c2   :  { %v454_v13 = vpop.permute.xlu0 %453 }
 0x2c3   :  { %2018 = vmatpush.xpose.msk.msra.mxu1 %vm298_vm8, %v454_v13 }
 0x2c6   :  { %2019 = vmatmul.msk.f32.vlgmr.msra.gmra.mxu1 %vm298_vm8, %v2569_v2 }
 0x2d0   :  { %v320_v20 = vpop.f32.mrf.mxu1 }
 0x2d1   :  { %v2604_v21 = vadd.f32 %v320_v20, %v2601_v19 }
 0x2d3   :  { %v505_v22 = vsel %vm298_vm8, %v2604_v21, -inf }
 0x2d4   :  { %506 = vmax.xlane.f32.xlu2 %v505_v22  ;;  %v2114_v22 = vpack.i.bf16 %v2571_v5, %v2555_v63 }
 0x311   :  { %v346_v23 = vpop.f32.mrf.mxu2 }
 0x312   :  { %v347_v24 = vadd.f32 %v346_v23, %v2601_v19 }
 0x314   :  { %v508_v25 = vsel %vm298_vm8, %v347_v24, -inf }
 0x315   :  { %509 = vmax.xlane.f32.xlu2 %v508_v25 }
 0x319   :  { %v424_v26 = vpop.f32.mrf.mxu2 }
 0x31a   :  { %v425_v42 = vadd.f32 %v424_v26, %v2601_v19 }
 0x31c   :  { %v517_v43 = vsel %vm298_vm8, %v425_v42, -inf }
 0x331   :  { %v372_v27 = vpop.f32.mrf.mxu3 }
 0x332   :  { %v373_v28 = vadd.f32 %v372_v27, %v2601_v19  ;;  %v502_v29 = vpop.f32.mrf.mxu2 }
 0x333   :  { %v2612_v30 = vadd.f32 %v502_v29, %v2601_v19 }
 0x334   :  { %v511_v31 = vsel %vm298_vm8, %v373_v28, -inf }
 0x335   :  { %512 = vmax.xlane.f32.xlu0 %v511_v31  ;;  %v526_v32 = vsel %vm298_vm8, %v2612_v30, -inf }
 0x336   :  { %527 = vmax.xlane.f32.xlu2 %v526_v32 }
 0x339   :  { %v450_v36 = vpop.f32.mrf.mxu3 }
 0x33a   :  { %v451_v37 = vadd.f32 %v450_v36, %v2601_v19 }
 0x33b   :  { %v398_v33 = vpop.f32.mrf.mxu1 }
 0x33c   :  { %v399_v34 = vadd.f32 %v398_v33, %v2601_v19  ;;  %v520_v40 = vsel %vm298_vm8, %v451_v37, -inf }
 0x33e   :  { %v514_v35 = vsel %vm298_vm8, %v399_v34, -inf }
 0x33f   :  { %515 = vmax.xlane.f32.xlu1 %v514_v35 }
 0x343   :  { %v476_v38 = vpop.f32.mrf.mxu1 }
 0x344   :  { %v477_v39 = vadd.f32 %v476_v38, %v2601_v19 }
 0x346   :  { %v523_v41 = vsel %vm298_vm8, %v477_v39, -inf }
 0x347   :  { %521 = vmax.xlane.f32.xlu1 %v520_v40  ;;  %524 = vmax.xlane.f32.xlu0 %v523_v41  ;;  %v507_v44 = vpop.xlane.xlu2 %506 }
 0x348   :  { %v529_v13 = vsub.f32 %v2604_v21, %v507_v44  ;;  %v2119_v21 = vpack.i.bf16 %v2569_v2, %v2561_v0 }
 0x34a   :  { %v537_v17 = vmul.f32 1.442695, %v529_v13 }
 0x34f   :  { %518 = vmax.xlane.f32.xlu0 %v517_v43 }
 0x388   :  { %v510_v45 = vpop.xlane.xlu2 %509 }
 0x389   :  { %v530_v46 = vsub.f32 %v347_v24, %v510_v45 }
 0x38b   :  { %v539_v47 = vmul.f32 1.442695, %v530_v46 }
 0x38d   :  { %2163 = vpow2.f32 %v539_v47 }
 0x393   :  { %v2625_v48 = vpop.eup %2163 }
 0x394   :  { %v556_v49 = vsel %vm298_vm8, %v2625_v48, 0.0 }
 0x395   :  { %557 = vadd.xlane.f32.xlu1 %v556_v49 }
 0x3a8   :  { %v513_v50 = vpop.xlane.xlu0 %512 }
 0x3a9   :  { %v531_v51 = vsub.f32 %v373_v28, %v513_v50  ;;  %v528_v25 = vpop.xlane.xlu2 %527 }
 0x3aa   :  { %v536_v26 = vsub.f32 %v2612_v30, %v528_v25 }
 0x3ab   :  { %v541_v52 = vmul.f32 1.442695, %v531_v51 }
 0x3ac   :  { %v551_v28 = vmul.f32 1.442695, %v536_v26 }
 0x3ad   :  { %2165 = vpow2.f32 %v541_v52 }
 0x3ae   :  { %2110 = vrot.lane.b32.xlu1 %v2109_v53, %s2334_s17 }
 0x3b2   :  { %v516_v54 = vpop.xlane.xlu1 %515 }
 0x3b3   :  { %v2632_v55 = vpop.eup %2165  ;;  %v532_v56 = vsub.f32 %v399_v34, %v516_v54 }
 0x3b4   :  { %v559_v57 = vsel %vm298_vm8, %v2632_v55, 0.0 }
 0x3b5   :  { %v543_v58 = vmul.f32 1.442695, %v532_v56  ;;  %560 = vadd.xlane.f32.xlu0 %v559_v57 }
 0x3b7   :  { %2167 = vpow2.f32 %v543_v58 }
 0x3ba   :  { %v522_v60 = vpop.xlane.xlu1 %521  ;;  %v525_v4 = vpop.xlane.xlu0 %524 }
 0x3bb   :  { %v534_v7 = vsub.f32 %v451_v37, %v522_v60  ;;  %v535_v8 = vsub.f32 %v477_v39, %v525_v4 }
 0x3bd   :  { %v2168_v9 = vpop.eup %2167  ;;  %v547_v62 = vmul.f32 1.442695, %v534_v7  ;;  %v549_v1 = vmul.f32 1.442695, %v535_v8 }
 0x3be   :  { %v562_v10 = vsel %vm298_vm8, %v2168_v9, 0.0 }
 0x3bf   :  { %2169 = vpow2.f32 %v547_v62  ;;  %563 = vadd.xlane.f32.xlu2 %v562_v10 }
 0x3c0   :  { %2171 = vpow2.f32 %v549_v1 }
 0x3c1   :  { %2173 = vpow2.f32 %v537_v17 }
 0x3c2   :  { %v519_v23 = vpop.xlane.xlu0 %518 }
 0x3c3   :  { %v533_v24 = vsub.f32 %v425_v42, %v519_v23 }
 0x3c5   :  { %v2170_v11 = vpop.eup %2169  ;;  %v545_v27 = vmul.f32 1.442695, %v533_v24 }
 0x3c6   :  { %v2637_v12 = vpop.eup %2171  ;;  %v568_v15 = vsel %vm298_vm8, %v2170_v11, 0.0 }
 0x3c7   :  { %569 = vadd.xlane.f32.xlu0 %v568_v15  ;;  %v571_v16 = vsel %vm298_vm8, %v2637_v12, 0.0  ;;  %v2643_v18 = vpop.eup %2173  ;;  %2175 = vpow2.f32 %v545_v27  ;;  %v160_v15 = vld [vmem:[%s2382_s3 + $0x8] sm:$0xff] }
 0x3c8   :  { %572 = vadd.xlane.f32.xlu2 %v571_v16  ;;  %v553_v20 = vsel %vm298_vm8, %v2643_v18, 0.0  ;;  %2177 = vpow2.f32 %v551_v28  ;;  %v159_v16 = vld [vmem:[%s2382_s3] sm:$0xff] }
 0x3cd   :  { %v2654_v29 = vpop.eup %2175 }
 0x3ce   :  { %v565_v63 = vsel %vm298_vm8, %v2654_v29, 0.0  ;;  %v2178_v5 = vpop.eup %2177 }
 0x3cf   :  { %v574_v0 = vsel %vm298_vm8, %v2178_v5, 0.0 }
 0x3d8   :  { %554 = vadd.xlane.f32.xlu1 %v553_v20 }
 0x3db   :  { %2115 = vrot.lane.b32.xlu0 %v2114_v22, %s2334_s17 }
 0x3e0   :  { %2120 = vrot.lane.b32.xlu2 %v2119_v21, %s2334_s17 }
 0x405   :  { %566 = vadd.xlane.f32.xlu0 %v565_v63 }
 0x408   :  { %v558_v2 = vpop.xlane.xlu1 %557 }
 0x409   :  { %575 = vadd.xlane.f32.xlu2 %v574_v0  ;;  %2179 = vrcp.f32 %v558_v2  ;;  %v2142_v0 = vld [vmem:[%s2387_s8] ss:$0 sm:$0xff]  ;;  %s3004_s8 = sld [smem:[#allocation12_spill]] }
 0x40f   :  { %v2180_v31 = vpop.eup %2179 }
 0x410   :  { %v586_v34 = vmul.f32 %v2180_v31, %v2625_v48 }
 0x420   :  { %v2111_v32 = vpop.permute.xlu1 %2110 }
 0x421   :  { %v2113_v33 = vunpack.i.h.bf16 %v2111_v32  ;;  %v2112_v30 = vunpack.i.l.bf16 %v2111_v32  ;;  %593 = vrot.lane.b32.xlu2 %v2533_v59, %s2334_s17 }
 0x423   :  { %640 = vmatpush.msrb.mxu2 %v2112_v30 }
 0x424   :  { %2023 = vmatmul.msk.f32.vlgmr.msrb.gmra.mxu2 %vm298_vm8, %v586_v34 }
 0x425   :  { %692 = vmatpush.msra.mxu2 %v2113_v33 }
 0x428   :  { %v561_v35 = vpop.xlane.xlu0 %560 }
 0x429   :  { %697 = vrot.lane.b32.xlu2 %v2539_v61, %s2334_s17 }
 0x432   :  { %v564_v36 = vpop.xlane.xlu2 %563 }
 0x433   :  { %2181 = vrcp.f32 %v564_v36 }
 0x439   :  { %v2182_v37 = vpop.eup %2181 }
 0x43a   :  { %v588_v38 = vmul.f32 %v2182_v37, %v2168_v9  ;;  %v570_v39 = vpop.xlane.xlu0 %569 }
 0x43b   :  { %v573_v40 = vpop.xlane.xlu2 %572  ;;  %2183 = vrcp.f32 %v570_v39 }
 0x43c   :  { %2025 = vmatmul.msk.f32.vlgmr.msra.gmra.mxu2 %vm298_vm8, %v588_v38  ;;  %2185 = vrcp.f32 %v561_v35 }
 0x43d   :  { %2187 = vrcp.f32 %v573_v40 }
 0x441   :  { %v2184_v59 = vpop.eup %2183 }
 0x442   :  { %v590_v43 = vmul.f32 %v2184_v59, %v2170_v11  ;;  %v2186_v44 = vpop.eup %2185  ;;  %v162_v11 = vld [vmem:[%s2382_s3 + $0x18] sm:$0xff] }
 0x443   :  { %v2121_v41 = vpop.permute.xlu2 %2120  ;;  %v587_v47 = vmul.f32 %v2186_v44, %v2632_v55  ;;  %v2188_v49 = vpop.eup %2187  ;;  %v169_v44 = vld [vmem:[%s2402_s24 + $0x18] sm:$0xff] }
 0x444   :  { %v2122_v42 = vunpack.i.l.bf16 %v2121_v41  ;;  %v2123_v48 = vunpack.i.h.bf16 %v2121_v41  ;;  %v591_v50 = vmul.f32 %v2188_v49, %v2637_v12  ;;  %v161_v12 = vld [vmem:[%s2382_s3 + $0x10] sm:$0xff]  ;;  %s3003_s3 = sld [smem:[#allocation9_spill]] }
 0x446   :  { %744 = vmatpush.msrb.mxu0 %v2122_v42 }
 0x447   :  { %2027 = vmatmul.msk.f32.vlgmr.msrb.gmra.mxu0 %vm298_vm8, %v590_v43 }
 0x44b   :  { %v555_v51 = vpop.xlane.xlu1 %554 }
 0x44c   :  { %2189 = vrcp.f32 %v555_v51 }
 0x44d   :  { %v2116_v61 = vpop.permute.xlu0 %2115 }
 0x44e   :  { %v2118_v45 = vunpack.i.h.bf16 %v2116_v61  ;;  %v2117_v46 = vunpack.i.l.bf16 %v2116_v61  ;;  %v168_v61 = vld [vmem:[%s2402_s24 + $0x10] sm:$0xff] }
 0x450   :  { %666 = vmatpush.msrb.mxu1 %v2117_v46  ;;  %796 = vmatpush.msrb.mxu2 %v2118_v45  ;;  %v167_v45 = vld [vmem:[%s2402_s24 + $0x8] sm:$0xff]  ;;  %v166_v46 = vld [vmem:[%s2402_s24] sm:$0xff]  ;;  %s3007_s24 = sld [smem:[#allocation13_spill]] }
 0x451   :  { %2024 = vmatmul.msk.f32.vlgmr.msrb.gmra.mxu1 %vm298_vm8, %v587_v47 }
 0x452   :  { %770 = vmatpush.msra.mxu1 %v2123_v48  ;;  %v2190_v54 = vpop.eup %2189 }
 0x453   :  { %v585_v55 = vmul.f32 %v2190_v54, %v2643_v18 }
 0x454   :  { %942 = vmatpush.msrb.mxu1 %v169_v44 }
 0x456   :  { %943 = vmatpush.msrb.mxu1 %v168_v61 }
 0x458   :  { %944 = vmatpush.msrb.mxu1 %v167_v45 }
 0x459   :  { %2028 = vmatmul.msk.f32.vlgmr.msra.gmra.mxu1 %vm298_vm8, %v591_v50 }
 0x45a   :  { %945 = vmatpush.msrb.mxu1 %v166_v46 }
 0x478   :  { %v567_v53 = vpop.xlane.xlu0 %566 }
 0x47c   :  { %v576_v52 = vpop.xlane.xlu2 %575 }
 0x47d   :  { %2191 = vrcp.f32 %v576_v52 }
 0x47e   :  { %2193 = vrcp.f32 %v567_v53 }
 0x483   :  { %v2192_v56 = vpop.eup %2191 }
 0x484   :  { %v592_v57 = vmul.f32 %v2192_v56, %v2178_v5  ;;  %v594_v58 = vpop.permute.xlu2 %593  ;;  %v2194_v60 = vpop.eup %2193 }
 0x485   :  { %614 = vmatpush.msra.mxu3 %v594_v58  ;;  %v589_v4 = vmul.f32 %v2194_v60, %v2654_v29  ;;  %v2144_v60 = vld [vmem:[%s2397_s19] ss:$0 sm:$0xff]  ;;  %s3006_s19 = sld [smem:[#allocation11_spill]] }
 0x486   :  { %2022 = vmatmul.msk.f32.vlgmr.msra.gmra.mxu3 %vm298_vm8, %v585_v55  ;;  %2029 = vmatmul.msk.f32.vlgmr.msrb.gmra.mxu2 %vm298_vm8, %v592_v57  ;;  %v2143_v55 = vld [vmem:[%s2392_s14] ss:$0 sm:$0xff]  ;;  %s3005_s14 = sld [smem:[#allocation10_spill]] }
 0x48c   :  { %v698_v7 = vpop.permute.xlu2 %697 }
 0x48d   :  { %718 = vmatpush.msrb.mxu3 %v698_v7 }
 0x48e   :  { %2026 = vmatmul.msk.f32.vlgmr.msrb.gmra.mxu3 %vm298_vm8, %v589_v4 }
 0x48f   :  { %854 = vmatpush.msra.mxu3 %v162_v11 }
 0x491   :  { %855 = vmatpush.msra.mxu3 %v161_v12 }
 0x493   :  { %856 = vmatpush.msra.mxu3 %v160_v15 }
 0x495   :  { %857 = vmatpush.msra.mxu3 %v159_v16 }
 0x4a7   :  { %v642_v8 = vpop.f32.mrf.mxu2 }
 0x4a8   :  { %802 = vrot.lane.b32.xlu2 %v642_v8, %s2335_s21 }
 0x4bf   :  { %v694_v62 = vpop.f32.mrf.mxu2 }
 0x4c4   :  { %v746_v9 = vpop.f32.mrf.mxu0 }
 0x4c5   :  { %819 = vrot.lane.b32.xlu2 %v746_v9, %s2335_s21 }
 0x4cd   :  { %810 = vrot.lane.b32.xlu2 %v694_v62, %s2336_s25 }
 0x4ce   :  { %v668_v1 = vpop.f32.mrf.mxu1 }
 0x4cf   :  { %806 = vrot.lane.b32.xlu1 %v668_v1, %s2337_s29 }
 0x4d6   :  { %v772_v10 = vpop.f32.mrf.mxu1 }
 0x4d7   :  { %823 = vrot.lane.b32.xlu0 %v772_v10, %s2337_s29 }
 0x502   :  { %v803_v17 = vpop.permute.xlu2 %802 }
 0x509   :  { %v798_v13 = vpop.f32.mrf.mxu2  ;;  %v616_v20 = vpop.f32.mrf.mxu3 }
 0x50a   :  { %827 = vrot.lane.b32.xlu2 %v798_v13, %s2336_s25  ;;  %v813_v22 = vsel %vm298_vm8, %v616_v20, %v803_v17 }
 0x511   :  { %v720_v27 = vpop.f32.mrf.mxu3 }
 0x51f   :  { %v820_v18 = vpop.permute.xlu2 %819 }
 0x520   :  { %v830_v28 = vsel %vm298_vm8, %v720_v27, %v820_v18  ;;  %v180_v27 = vld [vmem:[%s2412_s6 + $0x48] sm:$0xff] }
 0x527   :  { %v811_v23 = vpop.permute.xlu2 %810 }
 0x541   :  { %v807_v21 = vpop.permute.xlu1 %806 }
 0x542   :  { %v815_v24 = vsel %vm814_vm10, %v813_v22, %v807_v21  ;;  %v186_v22 = vld [vmem:[%s2412_s6 + $0x78] sm:$0xff]  ;;  %v185_v21 = vld [vmem:[%s2412_s6 + $0x70] sm:$0xff] }
 0x543   :  { %v817_v25 = vsel %vm816_vm11, %v815_v24, %v811_v23  ;;  %996 = vmatpush.msra.mxu1 %v186_v22  ;;  %v184_v23 = vld [vmem:[%s2412_s6 + $0x68] sm:$0xff]  ;;  %v183_v24 = vld [vmem:[%s2412_s6 + $0x60] sm:$0xff] }
 0x544   :  { %2030 = vmatmul.msk.f32.vlgmr.msra.gmra.mxu3 %vm188_vm0, %v817_v25  ;;  %v182_v25 = vld [vmem:[%s2412_s6 + $0x58] sm:$0xff] }
 0x545   :  { %997 = vmatpush.msra.mxu1 %v185_v21 }
 0x547   :  { %998 = vmatpush.msra.mxu1 %v184_v23 }
 0x549   :  { %v824_v26 = vpop.permute.xlu0 %823  ;;  %999 = vmatpush.msra.mxu1 %v183_v24 }
 0x54a   :  { %v831_v29 = vsel %vm814_vm10, %v830_v28, %v824_v26  ;;  %v181_v26 = vld [vmem:[%s2412_s6 + $0x50] sm:$0xff]  ;;  %v179_v28 = vld [vmem:[%s2412_s6 + $0x40] sm:$0xff] }
 0x54b   :  { %1000 = vmatpush.msra.mxu1 %v182_v25 }
 0x54d   :  { %1001 = vmatpush.msra.mxu1 %v181_v26 }
 0x54f   :  { %1002 = vmatpush.msra.mxu1 %v180_v27 }
 0x551   :  { %1003 = vmatpush.msra.mxu1 %v179_v28 }
 0x564   :  { %v828_v63 = vpop.permute.xlu2 %827 }
 0x565   :  { %v832_v5 = vsel %vm816_vm11, %v831_v29, %v828_v63  ;;  %v178_v29 = vld [vmem:[%s2412_s6 + $0x38] sm:$0xff]  ;;  %v177_v63 = vld [vmem:[%s2412_s6 + $0x30] sm:$0xff] }
 0x566   :  { %2031 = vmatmul.msk.f32.gmra.mxu3 %vm188_vm0, %v832_v5  ;;  %1004 = vmatpush.msra.mxu1 %v178_v29  ;;  %v176_v5 = vld [vmem:[%s2412_s6 + $0x28] sm:$0xff]  ;;  %v1026_v29 = vld [vmem:[%s3004_s8 + $0x18] sm:$0xff] }
 0x567   :  { %1132 = vmatpush.msra.mxu2 %v1026_v29 }
 0x568   :  { %1005 = vmatpush.msra.mxu1 %v177_v63  ;;  %v1025_v63 = vld [vmem:[%s3004_s8 + $0x10] sm:$0xff] }
 0x569   :  { %1133 = vmatpush.msra.mxu2 %v1025_v63 }
 0x56a   :  { %1006 = vmatpush.msra.mxu1 %v176_v5  ;;  %v1024_v5 = vld [vmem:[%s3004_s8 + $0x8] sm:$0xff] }
 0x56b   :  { %1134 = vmatpush.msra.mxu2 %v1024_v5 }
 0x5c7   :  { %v859_v2 = vpop.f32.mrf.mxu3 }
 0x5c8   :  { %v860_v31 = vadd.f32 %v2142_v0, %v859_v2  ;;  %v174_v2 = vld [vmem:[%s2412_s6 + $0x18] sm:$0xff] }
 0x5ca   :  { %v2696_v32 = vadd.f32 %v860_v31, %v2505_v3  ;;  %v2145_v31 = vld [vmem:[%s2407_s30] ss:$0 sm:$0xff]  ;;  %s3008_s30 = sld [smem:[#allocation14_spill]] }
 0x5cc   :  { %v867_v33 = vsel %vm188_vm0, %v2696_v32, 0.0 }
 0x5cd   :  { %868 = vadd.xlane.f32.xlu1 %v867_v33  ;;  %v173_v33 = vld [vmem:[%s2412_s6 + $0x10] sm:$0xff] }
 0x5e9   :  { %v862_v30 = vpop.f32.mrf.mxu3 }
 0x5ea   :  { %v863_v34 = vadd.f32 %v2142_v0, %v862_v30  ;;  %v175_v0 = vld [vmem:[%s2412_s6 + $0x20] sm:$0xff] }
 0x5eb   :  { %1007 = vmatpush.msra.mxu1 %v175_v0  ;;  %v1023_v0 = vld [vmem:[%s3004_s8] sm:$0xff] }
 0x5ec   :  { %v2701_v35 = vadd.f32 %v863_v34, %v2510_v6  ;;  %v172_v34 = vld [vmem:[%s2412_s6 + $0x8] sm:$0xff]  ;;  %1135 = vmatpush.msra.mxu2 %v1023_v0 }
 0x5ed   :  { %1008 = vmatpush.msra.mxu1 %v174_v2 }
 0x5ee   :  { %v870_v36 = vsel %vm188_vm0, %v2701_v35, 0.0 }
 0x5ef   :  { %871 = vadd.xlane.f32.xlu2 %v870_v36  ;;  %1009 = vmatpush.msra.mxu1 %v173_v33 }
 0x5f1   :  { %1010 = vmatpush.msra.mxu1 %v172_v34 }
 0x640   :  { %v869_v37 = vpop.xlane.xlu1 %868 }
 0x641   :  { %v873_v3 = vmul.f32 %v869_v37, %v2514_v14  ;;  %v171_v37 = vld [vmem:[%s2412_s6] sm:$0xff]  ;;  %s3009_s6 = sld [smem:[#allocation15_spill]] }
 0x642   :  { %1011 = vmatpush.msra.mxu1 %v171_v37 }
 0x643   :  { %v875_v38 = vsub.f32 %v2696_v32, %v873_v3 }
 0x645   :  { %v877_v39 = vmul.f32 %v875_v38, %v875_v38 }
 0x647   :  { %v879_v40 = vsel %vm188_vm0, %v877_v39, 0.0 }
 0x648   :  { %880 = vadd.xlane.f32.xlu0 %v879_v40 }
 0x662   :  { %v872_v59 = vpop.xlane.xlu2 %871 }
 0x663   :  { %v874_v6 = vmul.f32 %v872_v59, %v2514_v14 }
 0x665   :  { %v876_v41 = vsub.f32 %v2701_v35, %v874_v6 }
 0x667   :  { %v878_v42 = vmul.f32 %v876_v41, %v876_v41 }
 0x669   :  { %v882_v43 = vsel %vm188_vm0, %v878_v42, 0.0 }
 0x66a   :  { %883 = vadd.xlane.f32.xlu1 %v882_v43 }
 0x6bb   :  { %v881_v47 = vpop.xlane.xlu0 %880 }
 0x6bc   :  { %v885_v48 = vmul.f32 %v881_v47, %v2514_v14 }
 0x6be   :  { %v887_v49 = vadd.f32 1e-05, %v885_v48 }
 0x6c0   :  { %2195 = vrsqrt.f32 %v887_v49  ;;  %vm895_vm13 = vweird.f32 %v887_v49 }
 0x6c6   :  { %v2196_v50 = vpop.eup %2195 }
 0x6c7   :  { %v890_v51 = vmul.f32 %v2196_v50, %v887_v49  ;;  %vm896_vm12 = vweird.f32 %v2196_v50 }
 0x6c8   :  { %vm897_vm14 = vmor %vm895_vm13, %vm896_vm12 }
 0x6c9   :  { %v891_v52 = vmul.f32 %v2196_v50, %v890_v51 }
 0x6cb   :  { %v892_v53 = vmul.f32 0.5, %v891_v52 }
 0x6cd   :  { %v893_v54 = vsub.f32 1.5, %v892_v53 }
 0x6cf   :  { %v894_v56 = vmul.f32 %v2196_v50, %v893_v54 }
 0x6d1   :  { %v898_v57 = vsel %vm897_vm14, %v2196_v50, %v894_v56 }
 0x6d2   :  { %v909_v58 = vmul.f32 %v898_v57, %v875_v38 }
 0x6d4   :  { %v914_v4 = vmul.f32 %v2143_v55, %v909_v58 }
 0x6d6   :  { %v919_v7 = vadd.f32 %v2144_v60, %v914_v4 }
 0x6d8   :  { %2032 = vmatmul.msk.f32.vlgmr.msrb.gmra.mxu1 %vm188_vm0, %v919_v7 }
 0x6dd   :  { %v884_v8 = vpop.xlane.xlu1 %883 }
 0x6de   :  { %v886_v9 = vmul.f32 %v884_v8, %v2514_v14 }
 0x6e0   :  { %v888_v62 = vadd.f32 1e-05, %v886_v9 }
 0x6e2   :  { %2197 = vrsqrt.f32 %v888_v62  ;;  %vm905_vm1 = vweird.f32 %v888_v62 }
 0x6e8   :  { %v2198_v1 = vpop.eup %2197 }
 0x6e9   :  { %v900_v10 = vmul.f32 %v2198_v1, %v888_v62  ;;  %vm906_vm15 = vweird.f32 %v2198_v1 }
 0x6ea   :  { %vm907_vm2 = vmor %vm905_vm1, %vm906_vm15 }
 0x6eb   :  { %v901_v11 = vmul.f32 %v2198_v1, %v900_v10  ;;  %v2146_v10 = vld [vmem:[%s3003_s3] ss:$0 sm:$0xff] }
 0x6ed   :  { %v902_v12 = vmul.f32 0.5, %v901_v11 }
 0x6ef   :  { %v903_v13 = vsub.f32 1.5, %v902_v12 }
 0x6f1   :  { %v904_v15 = vmul.f32 %v2198_v1, %v903_v13 }
 0x6f3   :  { %v908_v16 = vsel %vm907_vm2, %v2198_v1, %v904_v15 }
 0x6f4   :  { %v910_v17 = vmul.f32 %v908_v16, %v876_v41 }
 0x6f6   :  { %v915_v18 = vmul.f32 %v2143_v55, %v910_v17 }
 0x6f8   :  { %v920_v20 = vadd.f32 %v2144_v60, %v915_v18 }
 0x6fa   :  { %2033 = vmatmul.msk.f32.gmra.mxu1 %vm188_vm0, %v920_v20 }
 0x755   :  { %v947_v30 = vpop.f32.mrf.mxu1 }
 0x756   :  { %v948_v36 = vadd.f32 %v2145_v31, %v947_v30 }
 0x758   :  { %v953_v3 = vmul.f32 -1.702, %v948_v36 }
 0x75a   :  { %v955_v38 = vmul.f32 1.442695, %v953_v3 }
 0x75c   :  { %2199 = vpow2.f32 %v955_v38 }
 0x762   :  { %v2200_v39 = vpop.eup %2199 }
 0x763   :  { %v959_v40 = vadd.f32 1.0, %v2200_v39  ;;  %v2147_v39 = vld [vmem:[%s3005_s14] ss:$0 sm:$0xff] }
 0x765   :  { %2201 = vrcp.f32 %v959_v40  ;;  %v972_v42 = vand.u32 2147483648, %v959_v40  ;;  %v970_v44 = vand.u32 2147483647, %v959_v40  ;;  %vm966_vm4 = vweird.f32 %v959_v40 }
 0x767   :  { %v973_v45 = vor.u32 1.1754944e-38, %v972_v42  ;;  %vm971_vm6 = vcmp.eq.f32.partialorder %v970_v44, 8.507059e+37 }
 0x76b   :  { %v2202_v59 = vpop.eup %2201 }
 0x76c   :  { %v962_v6 = vmul.f32 %v2202_v59, %v959_v40  ;;  %vm967_vm3 = vweird.f32 %v2202_v59 }
 0x76d   :  { %vm968_vm5 = vmor %vm966_vm4, %vm967_vm3 }
 0x76e   :  { %v963_v41 = vsub.f32 1.0, %v962_v6  ;;  %v2148_v6 = vld [vmem:[%s3006_s19] ss:$0 sm:$0xff] }
 0x770   :  { %v964_v43 = vmul.f32 %v2202_v59, %v963_v41 }
 0x772   :  { %v965_v61 = vadd.f32 %v2202_v59, %v964_v43 }
 0x774   :  { %v969_v46 = vsel %vm968_vm5, %v2202_v59, %v965_v61 }
 0x775   :  { %v974_v47 = vsel %vm971_vm6, %v973_v45, %v969_v46 }
 0x776   :  { %v991_v48 = vmul.f32 %v974_v47, %v948_v36 }
 0x777   :  { %v950_v49 = vpop.f32.mrf.mxu1 }
 0x778   :  { %v951_v50 = vadd.f32 %v2145_v31, %v950_v49  ;;  %1012 = vmatmul.f32.vlgmr.msra.gmra.mxu1 %v991_v48 }
 0x77a   :  { %v954_v51 = vmul.f32 -1.702, %v951_v50 }
 0x77c   :  { %v957_v52 = vmul.f32 1.442695, %v954_v51 }
 0x77e   :  { %2203 = vpow2.f32 %v957_v52 }
 0x784   :  { %v2204_v53 = vpop.eup %2203 }
 0x785   :  { %v960_v54 = vadd.f32 1.0, %v2204_v53 }
 0x787   :  { %2205 = vrcp.f32 %v960_v54  ;;  %v987_v58 = vand.u32 2147483648, %v960_v54  ;;  %v985_v4 = vand.u32 2147483647, %v960_v54  ;;  %vm981_vm9 = vweird.f32 %v960_v54 }
 0x789   :  { %v988_v8 = vor.u32 1.1754944e-38, %v987_v58  ;;  %vm986_vm13 = vcmp.eq.f32.partialorder %v985_v4, 8.507059e+37 }
 0x78d   :  { %v2206_v56 = vpop.eup %2205 }
 0x78e   :  { %v977_v55 = vmul.f32 %v2206_v56, %v960_v54  ;;  %vm982_vm7 = vweird.f32 %v2206_v56 }
 0x78f   :  { %vm983_vm12 = vmor %vm981_vm9, %vm982_vm7 }
 0x790   :  { %v978_v57 = vsub.f32 1.0, %v977_v55 }
 0x792   :  { %v979_v60 = vmul.f32 %v2206_v56, %v978_v57 }
 0x794   :  { %v980_v7 = vadd.f32 %v2206_v56, %v979_v60 }
 0x796   :  { %v984_v9 = vsel %vm983_vm12, %v2206_v56, %v980_v7  ;;  %v2149_v56 = vld [vmem:[%s3007_s24] ss:$0 sm:$0xff] }
 0x797   :  { %v989_v62 = vsel %vm986_vm13, %v988_v8, %v984_v9 }
 0x798   :  { %v992_v1 = vmul.f32 %v989_v62, %v951_v50 }
 0x79a   :  { %1015 = vmatmul.f32.gmra.mxu1 %v992_v1 }
 0x7f5   :  { %v1013_v11 = vpop.f32.mrf.mxu1 }
 0x7f6   :  { %v1014_v12 = vadd.f32 %v2146_v10, %v1013_v11 }
 0x7f8   :  { %v2740_v13 = vadd.f32 %v1014_v12, %v2696_v32 }
 0x7fa   :  { %v1057_v15 = vsel %vm188_vm0, %v2740_v13, 0.0 }
 0x7fb   :  { %1058 = vadd.xlane.f32.xlu2 %v1057_v15 }
 0x817   :  { %v1016_v16 = vpop.f32.mrf.mxu1 }
 0x818   :  { %v1017_v17 = vadd.f32 %v2146_v10, %v1016_v16 }
 0x81a   :  { %v2745_v18 = vadd.f32 %v1017_v17, %v2701_v35 }
 0x81c   :  { %v1060_v20 = vsel %vm188_vm0, %v2745_v18, 0.0 }
 0x81d   :  { %1061 = vadd.xlane.f32.xlu1 %v1060_v20 }
 0x86e   :  { %v1059_v22 = vpop.xlane.xlu2 %1058 }
 0x86f   :  { %v1063_v32 = vmul.f32 %v1059_v22, %v2514_v14 }
 0x871   :  { %v1065_v21 = vsub.f32 %v2740_v13, %v1063_v32 }
 0x873   :  { %v1067_v23 = vmul.f32 %v1065_v21, %v1065_v21 }
 0x875   :  { %v1069_v24 = vsel %vm188_vm0, %v1067_v23, 0.0 }
 0x876   :  { %1070 = vadd.xlane.f32.xlu0 %v1069_v24 }
 0x890   :  { %v1062_v25 = vpop.xlane.xlu1 %1061 }
 0x891   :  { %v1064_v35 = vmul.f32 %v1062_v25, %v2514_v14 }
 0x893   :  { %v1066_v26 = vsub.f32 %v2745_v18, %v1064_v35 }
 0x895   :  { %v1068_v27 = vmul.f32 %v1066_v26, %v1066_v26 }
 0x897   :  { %v1072_v28 = vsel %vm188_vm0, %v1068_v27, 0.0 }
 0x898   :  { %1073 = vadd.xlane.f32.xlu2 %v1072_v28 }
 0x8e9   :  { %v1071_v2 = vpop.xlane.xlu0 %1070 }
 0x8ea   :  { %v1075_v31 = vmul.f32 %v1071_v2, %v2514_v14 }
 0x8ec   :  { %v1077_v33 = vadd.f32 1e-05, %v1075_v31 }
 0x8ee   :  { %2207 = vrsqrt.f32 %v1077_v33  ;;  %vm1085_vm15 = vweird.f32 %v1077_v33 }
 0x8f4   :  { %v2208_v30 = vpop.eup %2207 }
 0x8f5   :  { %v1080_v34 = vmul.f32 %v2208_v30, %v1077_v33  ;;  %vm1086_vm14 = vweird.f32 %v2208_v30 }
 0x8f6   :  { %vm1087_vm1 = vmor %vm1085_vm15, %vm1086_vm14 }
 0x8f7   :  { %v1081_v36 = vmul.f32 %v2208_v30, %v1080_v34 }
 0x8f9   :  { %v1082_v37 = vmul.f32 0.5, %v1081_v36 }
 0x8fb   :  { %v1083_v3 = vsub.f32 1.5, %v1082_v37 }
 0x8fd   :  { %v1084_v38 = vmul.f32 %v2208_v30, %v1083_v3 }
 0x8ff   :  { %v1088_v40 = vsel %vm1087_vm1, %v2208_v30, %v1084_v38 }
 0x900   :  { %v1099_v59 = vmul.f32 %v1088_v40, %v1065_v21 }
 0x902   :  { %v1104_v41 = vmul.f32 %v2147_v39, %v1099_v59 }
 0x904   :  { %v1109_v42 = vadd.f32 %v2148_v6, %v1104_v41 }
 0x906   :  { %2034 = vmatmul.msk.f32.vlgmr.msra.gmra.mxu2 %vm188_vm0, %v1109_v42 }
 0x90b   :  { %v1074_v43 = vpop.xlane.xlu2 %1073 }
 0x90c   :  { %v1076_v44 = vmul.f32 %v1074_v43, %v2514_v14 }
 0x90e   :  { %v1078_v61 = vadd.f32 1e-05, %v1076_v44 }
 0x910   :  { %2209 = vrsqrt.f32 %v1078_v61  ;;  %vm1095_vm3 = vweird.f32 %v1078_v61 }
 0x916   :  { %v2210_v45 = vpop.eup %2209 }
 0x917   :  { %v1090_v46 = vmul.f32 %v2210_v45, %v1078_v61  ;;  %vm1096_vm2 = vweird.f32 %v2210_v45 }
 0x918   :  { %vm1097_vm4 = vmor %vm1095_vm3, %vm1096_vm2 }
 0x919   :  { %v1091_v47 = vmul.f32 %v2210_v45, %v1090_v46 }
 0x91b   :  { %v1092_v48 = vmul.f32 0.5, %v1091_v47 }
 0x91d   :  { %v1093_v49 = vsub.f32 1.5, %v1092_v48 }
 0x91f   :  { %v1094_v50 = vmul.f32 %v2210_v45, %v1093_v49 }
 0x921   :  { %v1098_v51 = vsel %vm1097_vm4, %v2210_v45, %v1094_v50  ;;  %vm1891_vm4 = vcmask 1040384  }
 0x922   :  { %v1100_v52 = vmul.f32 %v1098_v51, %v1066_v26 }
 0x924   :  { %v1105_v53 = vmul.f32 %v2147_v39, %v1100_v52 }
 0x926   :  { %v1110_v54 = vadd.f32 %v2148_v6, %v1105_v53 }
 0x928   :  { %2035 = vmatmul.msk.f32.gmra.mxu2 %vm188_vm0, %v1110_v54 }
 0x989   :  { %v1137_v55 = vpop.f32.mrf.mxu2 }
 0x98a   :  { %v2766_v57 = vadd.f32 %v2149_v56, %v1137_v55 }
 0x98c   :  { %1148 = vrot.lane.b32.xlu2 %v2766_v57, %s2329_s0  ;;  %1144 = vrot.lane.b32.xlu0 %v2766_v57, %s2330_s5 }
 0x98d   :  { %1146 = vrot.lane.b32.xlu1 %v2766_v57, %s2332_s13 }
 0x9ab   :  { %v1140_v58 = vpop.f32.mrf.mxu2 }
 0x9ac   :  { %v2774_v60 = vadd.f32 %v2149_v56, %v1140_v58 }
 0x9ae   :  { %1155 = vrot.lane.b32.xlu2 %v2774_v60, %s2329_s0  ;;  %1153 = vrot.lane.b32.xlu1 %v2774_v60, %s2332_s13  ;;  %s2281_s0 = sshra.s32 %s1962_s23, 4  ;;  %s2282_s0 = int_to_ptr.hbm [resolvable:$true] %s2281_s0 }
 0x9af   :  { %1151 = vrot.lane.b32.xlu0 %v2774_v60, %s2330_s5  ;;  %s2285_s5 = scalar_lea.hbm %s2497_s12, 2  ;;  %p2286_p6 = scmp.lt.s32.totalorder %s2282_s0, %s2497_s12 }
 0x9b7   :  { %1157 = vrot.lane.b32.xlu0 %v2766_v57, %s2331_s9 }
 0x9e6   :  { %v2784_v4 = vpop.permute.xlu2 %1148 }
 0x9e7   :  { %1235 = vrot.lane.b32.xlu0 %v2784_v4, %s2331_s9 }
 0x9fe   :  { %v2788_v7 = vpop.permute.xlu0 %1144 }
 0x9ff   :  { %v2790_v8 = vpop.permute.xlu1 %1146  ;;  %1183 = vrot.lane.b32.xlu2 %v2788_v7, %s2331_s9 }
 0xa00   :  { %1209 = vrot.lane.b32.xlu1 %v2790_v8, %s2331_s9  ;;  %v2124_v58 = vpack.i.bf16 %v2790_v8, %v2788_v7 }
 0xa07   :  { %1261 = vrot.lane.b32.xlu2 %v2774_v60, %s2331_s9 }
 0xa08   :  { %v2806_v1 = vpop.permute.xlu2 %1155 }
 0xa20   :  { %v2798_v9 = vpop.permute.xlu1 %1153 }
 0xa21   :  { %v2800_v62 = vpop.permute.xlu0 %1151  ;;  %1313 = vrot.lane.b32.xlu0 %v2798_v9, %s2331_s9 }
 0xa22   :  { %1287 = vrot.lane.b32.xlu1 %v2800_v62, %s2331_s9 }
 0xa29   :  { %v1158_v10 = vpop.permute.xlu0 %1157 }
 0xa2a   :  { %2036 = vmatpush.xpose.msk.msrb.mxu3 %vm298_vm8, %v1158_v10  ;;  %1339 = vrot.lane.b32.xlu1 %v2806_v1, %s2331_s9 }
 0xa2d   :  { %2037 = vmatmul.msk.f32.vlgmr.msrb.gmra.mxu3 %vm298_vm8, %v2766_v57 }
 0xa59   :  { %v1236_v11 = vpop.permute.xlu0 %1235  ;;  %v1184_v12 = vpop.permute.xlu2 %1183 }
 0xa5a   :  { %2038 = vmatpush.xpose.msk.msra.mxu0 %vm298_vm8, %v1184_v12  ;;  %2042 = vmatpush.xpose.msk.msra.mxu3 %vm298_vm8, %v1236_v11 }
 0xa5d   :  { %2039 = vmatmul.msk.f32.vlgmr.msra.gmra.mxu0 %vm298_vm8, %v2788_v7  ;;  %2043 = vmatmul.msk.f32.vlgmr.msra.gmra.mxu3 %vm298_vm8, %v2784_v4  ;;  %v2129_v7 = vpack.i.bf16 %v2800_v62, %v2784_v4 }
 0xa61   :  { %v1262_v15 = vpop.permute.xlu2 %1261 }
 0xa62   :  { %2044 = vmatpush.xpose.msk.msrb.mxu0 %vm298_vm8, %v1262_v15 }
 0xa65   :  { %2045 = vmatmul.msk.f32.vlgmr.msrb.gmra.mxu0 %vm298_vm8, %v2774_v60 }
 0xa72   :  { %v1210_v16 = vpop.permute.xlu1 %1209 }
 0xa73   :  { %2040 = vmatpush.xpose.msk.msrb.mxu2 %vm298_vm8, %v1210_v16 }
 0xa76   :  { %2041 = vmatmul.msk.f32.vlgmr.msrb.gmra.mxu2 %vm298_vm8, %v2790_v8 }
 0xa93   :  { %v1314_v17 = vpop.permute.xlu0 %1313 }
 0xa94   :  { %v1288_v20 = vpop.permute.xlu1 %1287  ;;  %2048 = vmatpush.xpose.msk.msrb.mxu3 %vm298_vm8, %v1314_v17 }
 0xa95   :  { %2046 = vmatpush.xpose.msk.msra.mxu2 %vm298_vm8, %v1288_v20 }
 0xa97   :  { %2049 = vmatmul.msk.f32.vlgmr.msrb.gmra.mxu3 %vm298_vm8, %v2798_v9 }
 0xa98   :  { %2047 = vmatmul.msk.f32.vlgmr.msra.gmra.mxu2 %vm298_vm8, %v2800_v62 }
 0xa9c   :  { %v1340_v22 = vpop.permute.xlu1 %1339 }
 0xa9d   :  { %2050 = vmatpush.xpose.msk.msra.mxu0 %vm298_vm8, %v1340_v22 }
 0xaa0   :  { %2051 = vmatmul.msk.f32.vlgmr.msra.gmra.mxu0 %vm298_vm8, %v2806_v1 }
 0xab0   :  { %v1180_v32 = vpop.f32.mrf.mxu3 }
 0xab1   :  { %v2839_v27 = vadd.f32 %v1180_v32, %v2601_v19  ;;  %v2134_v32 = vpack.i.bf16 %v2806_v1, %v2798_v9 }
 0xab3   :  { %v1365_v28 = vsel %vm298_vm8, %v2839_v27, -inf }
 0xada   :  { %v1206_v21 = vpop.f32.mrf.mxu0 }
 0xadb   :  { %v1207_v23 = vadd.f32 %v1206_v21, %v2601_v19 }
 0xadd   :  { %v1368_v24 = vsel %vm298_vm8, %v1207_v23, -inf }
 0xade   :  { %1369 = vmax.xlane.f32.xlu2 %v1368_v24 }
 0xae0   :  { %v1258_v25 = vpop.f32.mrf.mxu3 }
 0xae1   :  { %v1259_v35 = vadd.f32 %v1258_v25, %v2601_v19 }
 0xae2   :  { %v1284_v0 = vpop.f32.mrf.mxu0 }
 0xae3   :  { %v1374_v26 = vsel %vm298_vm8, %v1259_v35, -inf  ;;  %v2846_v2 = vadd.f32 %v1284_v0, %v2601_v19 }
 0xae4   :  { %1375 = vmax.xlane.f32.xlu1 %v1374_v26 }
 0xae5   :  { %v1377_v31 = vsel %vm298_vm8, %v2846_v2, -inf }
 0xaec   :  { %1366 = vmax.xlane.f32.xlu1 %v1365_v28 }
 0xaf9   :  { %v1232_v29 = vpop.f32.mrf.mxu2 }
 0xafa   :  { %v1233_v63 = vadd.f32 %v1232_v29, %v2601_v19 }
 0xafc   :  { %v1371_v5 = vsel %vm298_vm8, %v1233_v63, -inf }
 0xafd   :  { %1372 = vmax.xlane.f32.xlu0 %v1371_v5 }
 0xb05   :  { %1378 = vmax.xlane.f32.xlu0 %v1377_v31 }
 0xb1a   :  { %v1336_v33 = vpop.f32.mrf.mxu3 }
 0xb1b   :  { %v1310_v30 = vpop.f32.mrf.mxu2  ;;  %v1337_v34 = vadd.f32 %v1336_v33, %v2601_v19 }
 0xb1c   :  { %v1311_v36 = vadd.f32 %v1310_v30, %v2601_v19 }
 0xb1d   :  { %v1383_v37 = vsel %vm298_vm8, %v1337_v34, -inf  ;;  %v1362_v38 = vpop.f32.mrf.mxu0 }
 0xb1e   :  { %v1380_v3 = vsel %vm298_vm8, %v1311_v36, -inf  ;;  %1384 = vmax.xlane.f32.xlu0 %v1383_v37  ;;  %v1363_v39 = vadd.f32 %v1362_v38, %v2601_v19 }
 0xb1f   :  { %1381 = vmax.xlane.f32.xlu2 %v1380_v3 }
 0xb20   :  { %v1386_v40 = vsel %vm298_vm8, %v1363_v39, -inf }
 0xb27   :  { %1387 = vmax.xlane.f32.xlu2 %v1386_v40 }
 0xb51   :  { %v1370_v59 = vpop.xlane.xlu2 %1369 }
 0xb52   :  { %v1390_v6 = vsub.f32 %v1207_v23, %v1370_v59 }
 0xb54   :  { %v1399_v41 = vmul.f32 1.442695, %v1390_v6 }
 0xb56   :  { %2211 = vpow2.f32 %v1399_v41 }
 0xb57   :  { %v1376_v42 = vpop.xlane.xlu1 %1375 }
 0xb58   :  { %v1392_v43 = vsub.f32 %v1259_v35, %v1376_v42 }
 0xb5a   :  { %v1403_v44 = vmul.f32 1.442695, %v1392_v43 }
 0xb5c   :  { %v2856_v61 = vpop.eup %2211  ;;  %2213 = vpow2.f32 %v1403_v44 }
 0xb5d   :  { %v1416_v45 = vsel %vm298_vm8, %v2856_v61, 0.0 }
 0xb5e   :  { %1417 = vadd.xlane.f32.xlu2 %v1416_v45 }
 0xb5f   :  { %v1367_v20 = vpop.xlane.xlu1 %1366 }
 0xb60   :  { %v1389_v22 = vsub.f32 %v2839_v27, %v1367_v20 }
 0xb62   :  { %v2860_v46 = vpop.eup %2213  ;;  %v1397_v8 = vmul.f32 1.442695, %v1389_v22 }
 0xb63   :  { %v1422_v19 = vsel %vm298_vm8, %v2860_v46, 0.0 }
 0xb64   :  { %1423 = vadd.xlane.f32.xlu0 %v1422_v19 }
 0xb70   :  { %v1373_v47 = vpop.xlane.xlu0 %1372 }
 0xb71   :  { %v1391_v48 = vsub.f32 %v1233_v63, %v1373_v47 }
 0xb73   :  { %v1401_v49 = vmul.f32 1.442695, %v1391_v48 }
 0xb75   :  { %2215 = vpow2.f32 %v1401_v49 }
 0xb78   :  { %v1379_v52 = vpop.xlane.xlu0 %1378 }
 0xb79   :  { %v1393_v4 = vsub.f32 %v2846_v2, %v1379_v52 }
 0xb7b   :  { %v2216_v50 = vpop.eup %2215  ;;  %v1405_v62 = vmul.f32 1.442695, %v1393_v4 }
 0xb7c   :  { %v1419_v51 = vsel %vm298_vm8, %v2216_v50, 0.0 }
 0xb7d   :  { %1420 = vadd.xlane.f32.xlu1 %v1419_v51 }
 0xb91   :  { %v1385_v53 = vpop.xlane.xlu0 %1384 }
 0xb92   :  { %v1395_v54 = vsub.f32 %v1337_v34, %v1385_v53  ;;  %v1382_v56 = vpop.xlane.xlu2 %1381 }
 0xb93   :  { %v1394_v55 = vsub.f32 %v1311_v36, %v1382_v56 }
 0xb94   :  { %v1409_v10 = vmul.f32 1.442695, %v1395_v54 }
 0xb95   :  { %v1407_v11 = vmul.f32 1.442695, %v1394_v55 }
 0xb96   :  { %2217 = vpow2.f32 %v1409_v10  ;;  %2125 = vrot.lane.b32.xlu1 %v2124_v58, %s2334_s17 }
 0xb97   :  { %2219 = vpow2.f32 %v1407_v11 }
 0xb98   :  { %2221 = vpow2.f32 %v1397_v8 }
 0xb99   :  { %2223 = vpow2.f32 %v1405_v62 }
 0xb9a   :  { %v1388_v24 = vpop.xlane.xlu2 %1387 }
 0xb9b   :  { %v1396_v25 = vsub.f32 %v1363_v39, %v1388_v24 }
 0xb9c   :  { %v2218_v12 = vpop.eup %2217 }
 0xb9d   :  { %v2868_v15 = vpop.eup %2219  ;;  %v1431_v16 = vsel %vm298_vm8, %v2218_v12, 0.0  ;;  %v1411_v9 = vmul.f32 1.442695, %v1396_v25 }
 0xb9e   :  { %1432 = vadd.xlane.f32.xlu0 %v1431_v16  ;;  %v1428_v17 = vsel %vm298_vm8, %v2868_v15, 0.0  ;;  %v2880_v21 = vpop.eup %2221  ;;  %v1029_v16 = vld [vmem:[%s3008_s30 + $0x8] sm:$0xff] }
 0xb9f   :  { %1429 = vadd.xlane.f32.xlu2 %v1428_v17  ;;  %v1413_v23 = vsel %vm298_vm8, %v2880_v21, 0.0  ;;  %v2224_v35 = vpop.eup %2223  ;;  %2225 = vpow2.f32 %v1411_v9  ;;  %v1028_v17 = vld [vmem:[%s3008_s30] sm:$0xff] }
 0xba0   :  { %v1425_v1 = vsel %vm298_vm8, %v2224_v35, 0.0 }
 0xba5   :  { %v2226_v26 = vpop.eup %2225 }
 0xba6   :  { %v1434_v27 = vsel %vm298_vm8, %v2226_v26, 0.0 }
 0xbb2   :  { %2130 = vrot.lane.b32.xlu0 %v2129_v7, %s2334_s17 }
 0xbb7   :  { %2135 = vrot.lane.b32.xlu2 %v2134_v32, %s2334_s17 }
 0xbbf   :  { %1453 = vrot.lane.b32.xlu2 %v2766_v57, %s2334_s17 }
 0xbc0   :  { %1414 = vadd.xlane.f32.xlu1 %v1413_v23 }
 0xbd1   :  { %v1418_v57 = vpop.xlane.xlu2 %1417 }
 0xbd2   :  { %2227 = vrcp.f32 %v1418_v57 }
 0xbd7   :  { %v1424_v0 = vpop.xlane.xlu0 %1423 }
 0xbd8   :  { %v2228_v29 = vpop.eup %2227 }
 0xbd9   :  { %v1446_v33 = vmul.f32 %v2228_v29, %v2856_v61 }
 0xbdc   :  { %1426 = vadd.xlane.f32.xlu0 %v1425_v1 }
 0xbe8   :  { %1435 = vadd.xlane.f32.xlu2 %v1434_v27 }
 0xbf0   :  { %v1421_v28 = vpop.xlane.xlu1 %1420 }
 0xbf1   :  { %2229 = vrcp.f32 %v1421_v28 }
 0xbf7   :  { %v2230_v63 = vpop.eup %2229 }
 0xbf8   :  { %v1447_v30 = vmul.f32 %v2230_v63, %v2216_v50 }
 0xc00   :  { %1557 = vrot.lane.b32.xlu2 %v2774_v60, %s2334_s17 }
 0xc08   :  { %v2126_v5 = vpop.permute.xlu1 %2125 }
 0xc09   :  { %v2128_v2 = vunpack.i.h.bf16 %v2126_v5  ;;  %v2127_v31 = vunpack.i.l.bf16 %v2126_v5 }
 0xc0b   :  { %1500 = vmatpush.msra.mxu3 %v2127_v31  ;;  %1526 = vmatpush.msrb.mxu0 %v2128_v2 }
 0xc0c   :  { %2053 = vmatmul.msk.f32.vlgmr.msra.gmra.mxu3 %vm298_vm8, %v1446_v33  ;;  %2054 = vmatmul.msk.f32.vlgmr.msrb.gmra.mxu0 %vm298_vm8, %v1447_v30 }
 0xc11   :  { %v1433_v34 = vpop.xlane.xlu0 %1432 }
 0xc12   :  { %v1430_v36 = vpop.xlane.xlu2 %1429  ;;  %2231 = vrcp.f32 %v1433_v34 }
 0xc13   :  { %2233 = vrcp.f32 %v1424_v0 }
 0xc14   :  { %2235 = vrcp.f32 %v1430_v36 }
 0xc18   :  { %v2232_v60 = vpop.eup %2231 }
 0xc19   :  { %v1451_v38 = vmul.f32 %v2232_v60, %v2218_v12  ;;  %v2234_v39 = vpop.eup %2233  ;;  %v1031_v12 = vld [vmem:[%s3008_s30 + $0x18] sm:$0xff] }
 0xc1a   :  { %v2136_v37 = vpop.permute.xlu2 %2135  ;;  %v2236_v59 = vpop.eup %2235  ;;  %v1448_v43 = vmul.f32 %v2234_v39, %v2860_v46  ;;  %v1037_v39 = vld [vmem:[%s3010_s26 + $0x10] sm:$0xff] }
 0xc1b   :  { %v2137_v3 = vunpack.i.l.bf16 %v2136_v37  ;;  %v1450_v44 = vmul.f32 %v2236_v59, %v2868_v15  ;;  %v2138_v61 = vunpack.i.h.bf16 %v2136_v37  ;;  %v1030_v15 = vld [vmem:[%s3008_s30 + $0x10] sm:$0xff]  ;;  %v1035_v59 = vld [vmem:[%s3010_s26] sm:$0xff] }
 0xc1d   :  { %1630 = vmatpush.msra.mxu0 %v2137_v3 }
 0xc1e   :  { %2058 = vmatmul.msk.f32.vlgmr.msra.gmra.mxu0 %vm298_vm8, %v1451_v38  ;;  %v1038_v38 = vld [vmem:[%s3010_s26 + $0x18] sm:$0xff] }
 0xc22   :  { %v1454_v40 = vpop.permute.xlu2 %1453 }
 0xc23   :  { %1474 = vmatpush.msrb.mxu2 %v1454_v40  ;;  %v1036_v40 = vld [vmem:[%s3010_s26 + $0x8] sm:$0xff] }
 0xc24   :  { %v2131_v6 = vpop.permute.xlu0 %2130 }
 0xc25   :  { %v2133_v41 = vunpack.i.h.bf16 %v2131_v6  ;;  %v2132_v42 = vunpack.i.l.bf16 %v2131_v6 }
 0xc27   :  { %1552 = vmatpush.msrb.mxu1 %v2132_v42  ;;  %1604 = vmatpush.msrb.mxu3 %v2133_v41 }
 0xc28   :  { %2055 = vmatmul.msk.f32.vlgmr.msrb.gmra.mxu1 %vm298_vm8, %v1448_v43  ;;  %2057 = vmatmul.msk.f32.vlgmr.msrb.gmra.mxu3 %vm298_vm8, %v1450_v44 }
 0xc29   :  { %1656 = vmatpush.msra.mxu1 %v2138_v61  ;;  %1800 = vmatpush.msra.mxu3 %v1038_v38 }
 0xc2b   :  { %1801 = vmatpush.msra.mxu3 %v1037_v39 }
 0xc2d   :  { %1802 = vmatpush.msra.mxu3 %v1036_v40 }
 0xc2f   :  { %1803 = vmatpush.msra.mxu3 %v1035_v59 }
 0xc33   :  { %v1415_v45 = vpop.xlane.xlu1 %1414 }
 0xc34   :  { %2237 = vrcp.f32 %v1415_v45 }
 0xc3a   :  { %v2238_v19 = vpop.eup %2237 }
 0xc3b   :  { %v1445_v47 = vmul.f32 %v2238_v19, %v2880_v21 }
 0xc3d   :  { %2052 = vmatmul.msk.f32.vlgmr.msrb.gmra.mxu2 %vm298_vm8, %v1445_v47 }
 0xc4f   :  { %v1427_v48 = vpop.xlane.xlu0 %1426 }
 0xc50   :  { %2239 = vrcp.f32 %v1427_v48  ;;  %v2151_v48 = vld [vmem:[%s3011_s28] ss:$0 sm:$0xff] }
 0xc56   :  { %v2240_v49 = vpop.eup %2239 }
 0xc57   :  { %v1449_v51 = vmul.f32 %v2240_v49, %v2224_v35 }
 0xc5b   :  { %v1436_v46 = vpop.xlane.xlu2 %1435 }
 0xc5c   :  { %2241 = vrcp.f32 %v1436_v46 }
 0xc62   :  { %v2242_v50 = vpop.eup %2241 }
 0xc63   :  { %v1452_v52 = vmul.f32 %v2242_v50, %v2226_v26  ;;  %v1558_v53 = vpop.permute.xlu2 %1557  ;;  %v2150_v26 = vld [vmem:[%s3009_s6] ss:$0 sm:$0xff] }
 0xc64   :  { %1578 = vmatpush.msra.mxu2 %v1558_v53  ;;  %v2152_v50 = vld [vmem:[%s3012_s1] ss:$0 sm:$0xff] }
 0xc65   :  { %2056 = vmatmul.msk.f32.vlgmr.msra.gmra.mxu2 %vm298_vm8, %v1449_v51  ;;  %2059 = vmatmul.msk.f32.vlgmr.msra.gmra.mxu1 %vm298_vm8, %v1452_v52 }
 0xc66   :  { %1712 = vmatpush.msrb.mxu2 %v1031_v12 }
 0xc68   :  { %1713 = vmatpush.msrb.mxu2 %v1030_v15 }
 0xc6a   :  { %1714 = vmatpush.msrb.mxu2 %v1029_v16 }
 0xc6c   :  { %1715 = vmatpush.msrb.mxu2 %v1028_v17 }
 0xc89   :  { %v1528_v56 = vpop.f32.mrf.mxu0 }
 0xc8f   :  { %v1502_v54 = vpop.f32.mrf.mxu3 }
 0xc90   :  { %1662 = vrot.lane.b32.xlu2 %v1502_v54, %s2335_s21 }
 0xc98   :  { %1666 = vrot.lane.b32.xlu2 %v1528_v56, %s2337_s29 }
 0xc9b   :  { %v1632_v55 = vpop.f32.mrf.mxu0 }
 0xc9c   :  { %1681 = vrot.lane.b32.xlu0 %v1632_v55, %s2337_s29 }
 0xca5   :  { %v1554_v58 = vpop.f32.mrf.mxu1 }
 0xca6   :  { %1670 = vrot.lane.b32.xlu1 %v1554_v58, %s2336_s25 }
 0xcab   :  { %v1606_v10 = vpop.f32.mrf.mxu3 }
 0xcac   :  { %1677 = vrot.lane.b32.xlu2 %v1606_v10, %s2335_s21 }
 0xcc0   :  { %v1476_v7 = vpop.f32.mrf.mxu2 }
 0xce2   :  { %v1658_v11 = vpop.f32.mrf.mxu1 }
 0xce3   :  { %1685 = vrot.lane.b32.xlu2 %v1658_v11, %s2336_s25 }
 0xce8   :  { %v1580_v24 = vpop.f32.mrf.mxu2 }
 0xcea   :  { %v1663_v20 = vpop.permute.xlu2 %1662 }
 0xceb   :  { %v1673_v8 = vsel %vm298_vm8, %v1476_v7, %v1663_v20  ;;  %v1055_v7 = vld [vmem:[%s3013_s2 + $0x78] sm:$0xff] }
 0xcec   :  { %1854 = vmatpush.msrb.mxu0 %v1055_v7 }
 0xcf2   :  { %v1667_v22 = vpop.permute.xlu2 %1666 }
 0xcf3   :  { %v1674_v32 = vsel %vm814_vm10, %v1673_v8, %v1667_v22  ;;  %v1054_v8 = vld [vmem:[%s3013_s2 + $0x70] sm:$0xff] }
 0xcf4   :  { %1855 = vmatpush.msrb.mxu0 %v1054_v8 }
 0xd06   :  { %v1678_v4 = vpop.permute.xlu2 %1677 }
 0xd07   :  { %v1688_v25 = vsel %vm298_vm8, %v1580_v24, %v1678_v4  ;;  %v1050_v4 = vld [vmem:[%s3013_s2 + $0x50] sm:$0xff]  ;;  %v1048_v24 = vld [vmem:[%s3013_s2 + $0x40] sm:$0xff] }
 0xd0e   :  { %v1682_v62 = vpop.permute.xlu0 %1681 }
 0xd0f   :  { %v1689_v35 = vsel %vm814_vm10, %v1688_v25, %v1682_v62  ;;  %v1049_v62 = vld [vmem:[%s3013_s2 + $0x48] sm:$0xff]  ;;  %v1047_v25 = vld [vmem:[%s3013_s2 + $0x38] sm:$0xff] }
 0xd18   :  { %v1671_v21 = vpop.permute.xlu1 %1670 }
 0xd19   :  { %v1675_v23 = vsel %vm816_vm11, %v1674_v32, %v1671_v21  ;;  %v1053_v32 = vld [vmem:[%s3013_s2 + $0x68] sm:$0xff]  ;;  %v1052_v21 = vld [vmem:[%s3013_s2 + $0x60] sm:$0xff] }
 0xd1a   :  { %2060 = vmatmul.msk.f32.vlgmr.msrb.gmra.mxu2 %vm188_vm0, %v1675_v23  ;;  %1856 = vmatpush.msrb.mxu0 %v1053_v32  ;;  %v1051_v23 = vld [vmem:[%s3013_s2 + $0x58] sm:$0xff] }
 0xd1c   :  { %1857 = vmatpush.msrb.mxu0 %v1052_v21 }
 0xd1e   :  { %1858 = vmatpush.msrb.mxu0 %v1051_v23 }
 0xd20   :  { %1859 = vmatpush.msrb.mxu0 %v1050_v4  ;;  %v1929_v4 = vld [vmem:[%s2492_s4 + $0x18] sm:$0xff] }
 0xd21   :  { %1945 = vmatpush.msrb.mxu1 %v1929_v4 }
 0xd22   :  { %1860 = vmatpush.msrb.mxu0 %v1049_v62  ;;  %v1928_v62 = vld [vmem:[%s2492_s4 + $0x10] sm:$0xff] }
 0xd23   :  { %1946 = vmatpush.msrb.mxu1 %v1928_v62 }
 0xd24   :  { %1861 = vmatpush.msrb.mxu0 %v1048_v24  ;;  %v1927_v24 = vld [vmem:[%s2492_s4 + $0x8] sm:$0xff] }
 0xd25   :  { %1947 = vmatpush.msrb.mxu1 %v1927_v24 }
 0xd26   :  { %1862 = vmatpush.msrb.mxu0 %v1047_v25  ;;  %v1926_v25 = vld [vmem:[%s2492_s4] sm:$0xff]  ;;  %s2338_s4 = smov [#allocation6]  }
 0xd27   :  { %1948 = vmatpush.msrb.mxu1 %v1926_v25  ;;  %s1959_s22 = sshll.u32 %s2338_s4, 4  ;;  %s1960_s22 = int_to_ptr.vmem [resolvable:$true] %s1959_s22 }
 0xd3d   :  { %v1686_v9 = vpop.permute.xlu2 %1685 }
 0xd3e   :  { %v1690_v1 = vsel %vm816_vm11, %v1689_v35, %v1686_v9  ;;  %v1046_v35 = vld [vmem:[%s3013_s2 + $0x30] sm:$0xff]  ;;  %v1045_v9 = vld [vmem:[%s3013_s2 + $0x28] sm:$0xff] }
 0xd3f   :  { %2061 = vmatmul.msk.f32.gmra.mxu2 %vm188_vm0, %v1690_v1  ;;  %1863 = vmatpush.msrb.mxu0 %v1046_v35  ;;  %v1044_v1 = vld [vmem:[%s3013_s2 + $0x20] sm:$0xff] }
 0xd41   :  { %1864 = vmatpush.msrb.mxu0 %v1045_v9 }
 0xd43   :  { %1865 = vmatpush.msrb.mxu0 %v1044_v1 }
 0xd9d   :  { %v1717_v27 = vpop.f32.mrf.mxu2 }
 0xd9e   :  { %v1718_v57 = vadd.f32 %v2150_v26, %v1717_v27  ;;  %v2153_v27 = vld [vmem:[%s3014_s7] ss:$0 sm:$0xff] }
 0xda0   :  { %v2923_v28 = vadd.f32 %v1718_v57, %v2740_v13  ;;  %v1042_v57 = vld [vmem:[%s3013_s2 + $0x10] sm:$0xff] }
 0xda2   :  { %v1725_v29 = vsel %vm188_vm0, %v2923_v28, 0.0 }
 0xda3   :  { %1726 = vadd.xlane.f32.xlu2 %v1725_v29 }
 0xdc2   :  { %v1720_v63 = vpop.f32.mrf.mxu2 }
 0xdc3   :  { %v1721_v5 = vadd.f32 %v2150_v26, %v1720_v63  ;;  %v1043_v26 = vld [vmem:[%s3013_s2 + $0x18] sm:$0xff]  ;;  %v1041_v63 = vld [vmem:[%s3013_s2 + $0x8] sm:$0xff] }
 0xdc4   :  { %1866 = vmatpush.msrb.mxu0 %v1043_v26 }
 0xdc5   :  { %v2928_v0 = vadd.f32 %v1721_v5, %v2745_v18 }
 0xdc6   :  { %1867 = vmatpush.msrb.mxu0 %v1042_v57 }
 0xdc7   :  { %v1728_v2 = vsel %vm188_vm0, %v2928_v0, 0.0 }
 0xdc8   :  { %1729 = vadd.xlane.f32.xlu1 %v1728_v2  ;;  %1868 = vmatpush.msrb.mxu0 %v1041_v63  ;;  %v1040_v2 = vld [vmem:[%s3013_s2] sm:$0xff] }
 0xdca   :  { %1869 = vmatpush.msrb.mxu0 %v1040_v2  ;;  %v2155_v2 = vld [vmem:[%s2482_s20] ss:$0 sm:$0xff]  ;;  %s2283_s20 = scalar_lea.hbm %s2282_s0, 2 }
 0xdcb   :  { %p2284_p5 = scmp.ne.s32.totalorder %s2282_s0, %s2283_s20  ;;  %p2287_p7 = scmp.lt.s32.totalorder %s2285_s5, %s2283_s20 }
 0xdcd   :  { %p2288_p8 = por %p2287_p7, %p2286_p6 }
 0xdcf   :  { %p2289_p9 = pnand %p2288_p8, %p2284_p5 }
 0xe16   :  { %v1727_v31 = vpop.xlane.xlu2 %1726 }
 0xe17   :  { %v1731_v13 = vmul.f32 %v1727_v31, %v2514_v14 }
 0xe19   :  { %v1733_v33 = vsub.f32 %v2923_v28, %v1731_v13 }
 0xe1b   :  { %v1735_v30 = vmul.f32 %v1733_v33, %v1733_v33 }
 0xe1d   :  { %v1737_v34 = vsel %vm188_vm0, %v1735_v30, 0.0 }
 0xe1e   :  { %1738 = vadd.xlane.f32.xlu0 %v1737_v34 }
 0xe3b   :  { %v1730_v36 = vpop.xlane.xlu1 %1729 }
 0xe3c   :  { %v1732_v18 = vmul.f32 %v1730_v36, %v2514_v14 }
 0xe3e   :  { %v1734_v60 = vsub.f32 %v2928_v0, %v1732_v18 }
 0xe40   :  { %v1736_v37 = vmul.f32 %v1734_v60, %v1734_v60 }
 0xe42   :  { %v1740_v3 = vsel %vm188_vm0, %v1736_v37, 0.0 }
 0xe43   :  { %1741 = vadd.xlane.f32.xlu2 %v1740_v3 }
 0xe91   :  { %v1739_v6 = vpop.xlane.xlu0 %1738 }
 0xe92   :  { %v1743_v41 = vmul.f32 %v1739_v6, %v2514_v14 }
 0xe94   :  { %v1745_v42 = vadd.f32 1e-05, %v1743_v41 }
 0xe96   :  { %2243 = vrsqrt.f32 %v1745_v42  ;;  %vm1753_vm10 = vweird.f32 %v1745_v42 }
 0xe9c   :  { %v2244_v43 = vpop.eup %2243 }
 0xe9d   :  { %v1748_v44 = vmul.f32 %v2244_v43, %v1745_v42  ;;  %vm1754_vm8 = vweird.f32 %v2244_v43 }
 0xe9e   :  { %vm1755_vm11 = vmor %vm1753_vm10, %vm1754_vm8  ;;  %vm1895_vm8 = vcmask 254976  }
 0xe9f   :  { %v1749_v61 = vmul.f32 %v2244_v43, %v1748_v44 }
 0xea1   :  { %v1750_v45 = vmul.f32 0.5, %v1749_v61 }
 0xea3   :  { %v1751_v19 = vsub.f32 1.5, %v1750_v45 }
 0xea5   :  { %v1752_v47 = vmul.f32 %v2244_v43, %v1751_v19 }
 0xea7   :  { %v1756_v46 = vsel %vm1755_vm11, %v2244_v43, %v1752_v47 }
 0xea8   :  { %v1767_v49 = vmul.f32 %v1756_v46, %v1733_v33 }
 0xeaa   :  { %v1772_v51 = vmul.f32 %v2151_v48, %v1767_v49 }
 0xeac   :  { %v1777_v52 = vadd.f32 %v2152_v50, %v1772_v51 }
 0xeae   :  { %2062 = vmatmul.msk.f32.vlgmr.msra.gmra.mxu3 %vm188_vm0, %v1777_v52 }
 0xeb6   :  { %v1742_v53 = vpop.xlane.xlu2 %1741 }
 0xeb7   :  { %v1744_v54 = vmul.f32 %v1742_v53, %v2514_v14 }
 0xeb9   :  { %v1746_v56 = vadd.f32 1e-05, %v1744_v54 }
 0xebb   :  { %2245 = vrsqrt.f32 %v1746_v56  ;;  %vm1763_vm6 = vweird.f32 %v1746_v56 }
 0xec1   :  { %v2246_v55 = vpop.eup %2245 }
 0xec2   :  { %v1758_v58 = vmul.f32 %v2246_v55, %v1746_v56  ;;  %vm1764_vm5 = vweird.f32 %v2246_v55 }
 0xec3   :  { %vm1765_vm7 = vmor %vm1763_vm6, %vm1764_vm5 }
 0xec4   :  { %v1759_v10 = vmul.f32 %v2246_v55, %v1758_v58 }
 0xec6   :  { %v1760_v11 = vmul.f32 0.5, %v1759_v10 }
 0xec8   :  { %v1761_v12 = vsub.f32 1.5, %v1760_v11 }
 0xeca   :  { %v1762_v15 = vmul.f32 %v2246_v55, %v1761_v12 }
 0xecc   :  { %v1766_v16 = vsel %vm1765_vm7, %v2246_v55, %v1762_v15  ;;  %v2154_v55 = vld [vmem:[%s3015_s10] ss:$0 sm:$0xff] }
 0xecd   :  { %v1768_v17 = vmul.f32 %v1766_v16, %v1734_v60 }
 0xecf   :  { %v1773_v20 = vmul.f32 %v2151_v48, %v1768_v17 }
 0xed1   :  { %v1778_v22 = vadd.f32 %v2152_v50, %v1773_v20 }
 0xed3   :  { %2063 = vmatmul.msk.f32.gmra.mxu3 %vm188_vm0, %v1778_v22 }
 0xf31   :  { %v1805_v29 = vpop.f32.mrf.mxu3 }
 0xf32   :  { %v1806_v5 = vadd.f32 %v2153_v27, %v1805_v29 }
 0xf34   :  { %v1811_v31 = vmul.f32 -1.702, %v1806_v5 }
 0xf36   :  { %v1813_v13 = vmul.f32 1.442695, %v1811_v31 }
 0xf38   :  { %2247 = vpow2.f32 %v1813_v13 }
 0xf3e   :  { %v2248_v33 = vpop.eup %2247 }
 0xf3f   :  { %v1817_v30 = vadd.f32 1.0, %v2248_v33  ;;  %v2156_v33 = vld [vmem:[%s2487_s27] ss:$0 sm:$0xff] }
 0xf41   :  { %2249 = vrcp.f32 %v1817_v30  ;;  %v1830_v60 = vand.u32 2147483648, %v1817_v30  ;;  %v1828_v3 = vand.u32 2147483647, %v1817_v30  ;;  %vm1824_vm12 = vweird.f32 %v1817_v30 }
 0xf43   :  { %v1831_v39 = vor.u32 1.1754944e-38, %v1830_v60  ;;  %vm1829_vm14 = vcmp.eq.f32.partialorder %v1828_v3, 8.507059e+37 }
 0xf47   :  { %v2250_v34 = vpop.eup %2249 }
 0xf48   :  { %v1820_v36 = vmul.f32 %v2250_v34, %v1817_v30  ;;  %vm1825_vm9 = vweird.f32 %v2250_v34 }
 0xf49   :  { %vm1826_vm13 = vmor %vm1824_vm12, %vm1825_vm9 }
 0xf4a   :  { %v1821_v18 = vsub.f32 1.0, %v1820_v36 }
 0xf4c   :  { %v1822_v37 = vmul.f32 %v2250_v34, %v1821_v18 }
 0xf4e   :  { %v1823_v38 = vadd.f32 %v2250_v34, %v1822_v37 }
 0xf50   :  { %v1827_v40 = vsel %vm1826_vm13, %v2250_v34, %v1823_v38 }
 0xf51   :  { %v1832_v59 = vsel %vm1829_vm14, %v1831_v39, %v1827_v40 }
 0xf52   :  { %v1849_v6 = vmul.f32 %v1832_v59, %v1806_v5 }
 0xf54   :  { %1870 = vmatmul.f32.vlgmr.msrb.gmra.mxu0 %v1849_v6 }
 0xf56   :  { %v1808_v41 = vpop.f32.mrf.mxu3 }
 0xf57   :  { %v1809_v42 = vadd.f32 %v2153_v27, %v1808_v41 }
 0xf59   :  { %v1812_v43 = vmul.f32 -1.702, %v1809_v42 }
 0xf5b   :  { %v1815_v44 = vmul.f32 1.442695, %v1812_v43 }
 0xf5d   :  { %2251 = vpow2.f32 %v1815_v44 }
 0xf63   :  { %v2252_v61 = vpop.eup %2251 }
 0xf64   :  { %v1818_v45 = vadd.f32 1.0, %v2252_v61 }
 0xf66   :  { %2253 = vrcp.f32 %v1818_v45  ;;  %v1845_v46 = vand.u32 2147483648, %v1818_v45  ;;  %v1843_v50 = vand.u32 2147483647, %v1818_v45  ;;  %vm1839_vm1 = vweird.f32 %v1818_v45 }
 0xf68   :  { %v1846_v52 = vor.u32 1.1754944e-38, %v1845_v46  ;;  %vm1844_vm3 = vcmp.eq.f32.partialorder %v1843_v50, 8.507059e+37 }
 0xf6c   :  { %v2254_v19 = vpop.eup %2253 }
 0xf6d   :  { %v1835_v47 = vmul.f32 %v2254_v19, %v1818_v45  ;;  %vm1840_vm15 = vweird.f32 %v2254_v19 }
 0xf6e   :  { %vm1841_vm2 = vmor %vm1839_vm1, %vm1840_vm15 }
 0xf6f   :  { %v1836_v48 = vsub.f32 1.0, %v1835_v47 }
 0xf71   :  { %v1837_v49 = vmul.f32 %v2254_v19, %v1836_v48 }
 0xf73   :  { %v1838_v51 = vadd.f32 %v2254_v19, %v1837_v49 }
 0xf75   :  { %v1842_v53 = vsel %vm1841_vm2, %v2254_v19, %v1838_v51 }
 0xf76   :  { %v1847_v54 = vsel %vm1844_vm3, %v1846_v52, %v1842_v53 }
 0xf77   :  { %v1850_v56 = vmul.f32 %v1847_v54, %v1809_v42 }
 0xf79   :  { %1873 = vmatmul.f32.gmra.mxu0 %v1850_v56 }
 0xfd1   :  { %v1871_v58 = vpop.f32.mrf.mxu0 }
 0xfd2   :  { %v1872_v10 = vadd.f32 %v2154_v55, %v1871_v58 }
 0xfd4   :  { %v1877_v11 = vadd.f32 %v1872_v10, %v2923_v28 }
 0xfd6   :  { %1879 = vst.msk [vmem:[#allocation2] sm:$0xff] %vm188_vm0, %v1877_v11 }
 0xff6   :  { %v1874_v12 = vpop.f32.mrf.mxu0 }
 0xff7   :  { %v1875_v15 = vadd.f32 %v2154_v55, %v1874_v12 }
 0xff9   :  { %v1878_v16 = vadd.f32 %v1875_v15, %v2928_v0 }
 0xffb   :  { %1880 = vst.msk [vmem:[#allocation2 + $0x8] sm:$0xff] %vm188_vm0, %v1878_v16 }
0x1002   :  { %v2065_v17 = vld [vmem:[%s1972_s16 + $0x8] sm:$0x1]  ;;  %v1883_v28 = vld [vmem:[%s1882_s18] sm:$0x1] }
0x1003   :  { %v1889_v20 = vrot.slane %v2065_v17, 7 }
0x1005   :  { %v1892_v22 = vsel %vm1891_vm4, %v1883_v28, %v1889_v20 }
0x1006   :  { %v1896_v7 = vsel %vm1895_vm8, %v1892_v22, 0.0 }
0x1007   :  { %1897 = vadd.xlane.f32.xlu1 %v1896_v7 }
0x107a   :  { %v1898_v8 = vpop.xlane.xlu1 %1897 }
0x107b   :  { %v1899_v0 = vmul.f32 %v1898_v8, %v2514_v14 }
0x107d   :  { %v1900_v32 = vsub.f32 %v1892_v22, %v1899_v0 }
0x107f   :  { %v1901_v21 = vmul.f32 %v1900_v32, %v1900_v32 }
0x1081   :  { %v1902_v23 = vsel %vm1895_vm8, %v1901_v21, 0.0 }
0x1082   :  { %1903 = vadd.xlane.f32.xlu0 %v1902_v23 }
0x10f5   :  { %v1904_v35 = vpop.xlane.xlu0 %1903 }
0x10f6   :  { %v1905_v9 = vmul.f32 %v1904_v35, %v2514_v14 }
0x10f8   :  { %v1906_v1 = vadd.f32 1e-05, %v1905_v9 }
0x10fa   :  { %2255 = vrsqrt.f32 %v1906_v1  ;;  %vm1913_vm11 = vweird.f32 %v1906_v1 }
0x1100   :  { %v2256_v26 = vpop.eup %2255 }
0x1101   :  { %v1908_v27 = vmul.f32 %v2256_v26, %v1906_v1  ;;  %vm1914_vm10 = vweird.f32 %v2256_v26 }
0x1102   :  { %vm1915_vm5 = vmor %vm1913_vm11, %vm1914_vm10 }
0x1103   :  { %v1909_v57 = vmul.f32 %v2256_v26, %v1908_v27 }
0x1105   :  { %v1910_v29 = vmul.f32 0.5, %v1909_v57 }
0x1107   :  { %v1911_v63 = vsub.f32 1.5, %v1910_v29 }
0x1109   :  { %v1912_v5 = vmul.f32 %v2256_v26, %v1911_v63 }
0x110b   :  { %v1916_v31 = vsel %vm1915_vm5, %v2256_v26, %v1912_v5 }
0x110c   :  { %v1917_v13 = vmul.f32 %v1916_v31, %v1900_v32 }
0x110e   :  { %v1921_v30 = vmul.f32 %v2155_v2, %v1917_v13 }
0x1110   :  { %v1925_v14 = vadd.f32 %v2156_v33, %v1921_v30 }
0x1112   :  { %2066 = vmatmul.msk.f32.vlgmr.msrb.gmra.mxu1 %vm188_vm0, %v1925_v14 }
0x118f   :  { %v1950_v34 = vpop.f32.mrf.mxu1 }
0x1190   :  { %1953 = vst.msk [vmem:[#allocation6] sm:$0x3] %vm1895_vm8, %v1950_v34 }
0x1191   :  { %2292 = shalt.err (!%p2289_p9)
}
0x1192   :  { %1964 = dma.vmem_to_hbm [thread:$0]  %s1960_s22, 32, %s1962_s23, [#allocation4]  }
0x1193   :  { %2295 = dma.done.wait [#allocation4], 32  }
0x1194   :  { %2296 = vsyncadd [#allocation4], 4294967264 }
0x1195   :  { %1969 = vsyncpa [#allocation4], 1 }
0x1196   :  { %1970 = vsyncpa [#allocation5], 1 }

</bundles_post_ra>
